<compile_context>
chip_gen: v7x
topology: tpu7x:2x2x1
jax: 0.10.0
libtpu: 0.0.40
codegen_flags: <defaults>
</compile_context>

<pallas_src>
import jax
import jax.numpy as jnp
from jax.experimental import pallas as pl
from jax.experimental.pallas import tpu as pltpu

NEG_BIG = -1e12


def prediction_kernel(
    # batch-tiled data refs
    cl_ref, enc_ref, smask_ref, pades_ref, nmask_ref,
    # fused gating weights
    wc_gate_ref, bc_gate_ref, wl_gate_ref,
    # TreeAttn weights
    wa_hid_ref, wa_enc_ref, ba_ref, ws_row_ref, bs_ref,
    # fused leaf (Score.base | ops) weights, Score emb weights
    w_leaf_ref, b_leaf_ref, wsa_emb_ref, wss_row_ref, emb_proj_ref,
    # outputs
    num_score_ref, op_ref, node_ref, ctx_ref,
):
    f32 = jnp.float32
    TB, S, H = enc_ref.shape            # static block shape (S padded to a multiple of 8)
    cdt = wc_gate_ref.dtype             # MXU operand dtype (f32 or bf16)

    c = cl_ref[:, 0, :]                 # (TB, H) current embedding
    l = cl_ref[:, 1, :]                 # (TB, H) left-child embedding (zeros if None)
    hl = cl_ref[:, 2, :]                # (TB, H) has-left flag broadcast

    # ---- fused gating (dropout == identity in eval mode) ----
    proj_c = jnp.dot(c.astype(cdt), wc_gate_ref[...],
                     preferred_element_type=f32) + bc_gate_ref[...]          # (TB, 4H)
    proj_l = jnp.dot(l.astype(cdt), wl_gate_ref[...],
                     preferred_element_type=f32)                             # (TB, 2H)
    g_none = jnp.tanh(proj_c[:, 0:H])
    t_none = jax.nn.sigmoid(proj_c[:, H:2 * H])
    g_left = jnp.tanh(proj_c[:, 2 * H:3 * H] + proj_l[:, 0:H])
    t_left = jax.nn.sigmoid(proj_c[:, 3 * H:4 * H] + proj_l[:, H:2 * H])
    node = jnp.where(hl > 0.5, g_left * t_left, g_none * t_none)             # (TB, H) f32

    # ---- TreeAttn: lane-major masked softmax over S ----
    enc = enc_ref[...]                                                       # (TB, S, H) f32
    node_attn = jnp.dot(node.astype(cdt), wa_hid_ref[...],
                        preferred_element_type=f32) + ba_ref[...]            # (TB, H)
    enc_attn = jnp.dot(enc.reshape(TB * S, H).astype(cdt), wa_enc_ref[...],
                       preferred_element_type=f32).reshape(TB, S, H)         # (TB, S, H)
    feat = jnp.tanh(node_attn[:, None, :] + enc_attn)                        # (TB, S, H)
    ws_row3 = ws_row_ref[...][None, :, :]                                    # (1, 1, H)
    energies = jnp.sum(feat * ws_row3, axis=-1) + bs_ref[...]                # (TB, S)
    energies = jnp.where(smask_ref[...] > 0.5, NEG_BIG, energies)            # mask in f32
    m = jnp.max(energies, axis=-1, keepdims=True)
    e = jnp.exp(energies - m)
    attn = e * pl.reciprocal(jnp.sum(e, axis=-1, keepdims=True), approx=True)  # (TB, S)
    # TODO(synk): if profiling at large S*H shows this batched M=1 einsum is MXU-bound,
    # switch to the VPU/XLU weighted sum jnp.sum(attn[:, :, None] * enc, axis=1).
    context = jnp.einsum('bqs,bsh->bqh', attn[:, None, :], enc,
                         preferred_element_type=f32)[:, 0, :]                # (TB, H)

    # ---- fused Score-base + ops over leaf = cat(node, context) ----
    leaf = jnp.concatenate([node, context], axis=-1).astype(cdt)             # (TB, 2H)
    proj_leaf = jnp.dot(leaf, w_leaf_ref[...],
                        preferred_element_type=f32) + b_leaf_ref[...]        # (TB, H+OP)
    base = proj_leaf[:, :H]                                                  # (TB, H)
    op = proj_leaf[:, H:]                                                    # (TB, OP)

    base3 = base[:, None, :]                                                 # (TB, 1, H)
    wss_row3 = wss_row_ref[...][None, :, :]                                  # (1, 1, H)

    # constant-embedding part: projection hoisted to the wrapper (emb_proj = emb_w @ Wsa_emb)
    e_const = jnp.tanh(base3 + emb_proj_ref[...][None, :, :])                # (TB, IN_SZ, H)
    ns_const = jnp.sum(e_const * wss_row3, axis=-1)                          # (TB, IN_SZ)

    # num_pades part: ONE fused matmul over all (padded) quantity slots
    NPP = pades_ref.shape[1]                                                 # multiple of 8
    proj_p = jnp.dot(pades_ref[...].reshape(TB * NPP, H).astype(cdt), wsa_emb_ref[...],
                     preferred_element_type=f32).reshape(TB, NPP, H)
    e_p = jnp.tanh(base3 + proj_p)                                           # (TB, NPP, H)
    ns_pades = jnp.sum(e_p * wss_row3, axis=-1)                              # (TB, NPP)

    nscore = jnp.concatenate([ns_const, ns_pades], axis=-1)                  # (TB, IN_SZ+NPP)
    nscore = jnp.where(nmask_ref[...] > 0.5, NEG_BIG, nscore)

    # lane-dense stores (last dim = NPAD / OP / H)
    num_score_ref[...] = nscore
    op_ref[...] = op
    node_ref[...] = node
    ctx_ref[...] = context


def _make_specs(TB, SP, H, NPP, NPAD, IN_SZ, OP):
    def bt3(d1, d2):
        return pl.BlockSpec((TB, d1, d2), lambda b: (b, 0, 0))

    def bt2(d):
        return pl.BlockSpec((TB, d), lambda b: (b, 0))

    def cst(d1, d2):
        # constant-index weight blocks (resident across the whole grid)
        # TODO(synk): on v7x (64 MiB VMEM) consider pipeline_mode=pl.Buffered(1) + vmem_limit.
        return pl.BlockSpec((d1, d2), lambda b: (0, 0))

    in_specs = [
        bt3(3, H),          # cl = [c ; l ; has_left]
        bt3(SP, H),         # encoder outputs (batch-major)
        bt2(SP),            # seq mask
        bt3(NPP, H),        # num_pades (slot-padded to a multiple of 8)
        bt2(NPAD),          # mask_nums (lane-padded)
        cst(H, 4 * H), cst(1, 4 * H),     # fused gating on c
        cst(H, 2 * H),                    # fused gating on l
        cst(H, H), cst(H, H), cst(1, H),  # TreeAttn.attn (hidden / enc split) + bias
        cst(1, H), cst(1, 1),             # TreeAttn.score (row vector) + bias
        cst(2 * H, H + OP), cst(1, H + OP),  # fused [Score.attn node|ctx ; ops] + bias
        cst(H, H),                        # Score.attn emb part (for num_pades)
        cst(1, H),                        # Score.score (row vector, no bias)
        cst(IN_SZ, H),                    # hoisted emb_w @ Wsa_emb
    ]
    out_specs = [bt2(NPAD), bt2(OP), bt2(H), bt2(H)]
    return in_specs, out_specs


def prediction_forward(params, c, l, has_left, encoder_outputs, num_pades, seq_mask,
                       mask_nums, *, use_bf16=False, batch_tile=None):
    """c/l: [B,H]; has_left: [B]; encoder_outputs: [S,B,H] (PyTorch layout);
    num_pades: [B,NP,H]; seq_mask: [B,S]; mask_nums: [B,N]."""
    f32 = jnp.float32
    cdt = jnp.bfloat16 if use_bf16 else jnp.float32

    B, H = c.shape
    S = encoder_outputs.shape[0]
    emb_w = params["embedding_weight"]            # (1, IN_SZ, H)
    IN_SZ = emb_w.shape[1]
    NP = num_pades.shape[1]
    N = IN_SZ + NP
    OP = params["bop"].shape[1]

    # module output: embedding table = cat(tile(emb_w, B), num_pades)  (built by XLA)
    emb_all = jnp.concatenate([jnp.tile(emb_w, (B, 1, 1)), num_pades.astype(emb_w.dtype)], axis=1)

    def rup(x, m):
        return ((x + m - 1) // m) * m

    TB = batch_tile if batch_tile is not None else min(128, rup(B, 8))   # >=8 f32 sublanes
    BP = rup(B, TB)
    SP = rup(S, 8)                                                       # keep reshape sublane-aligned
    NPP = rup(max(NP, 1), 8)                                             # slot-padded quantity count
    NPAD = IN_SZ + NPP

    # TODO(synk): produce encoder outputs batch-major upstream to avoid this HBM transpose.
    enc_bsh = jnp.transpose(encoder_outputs, (1, 0, 2)).astype(f32)      # (B, S, H)
    hl_b = jnp.broadcast_to(has_left.astype(f32)[:, None], (B, H))
    cl = jnp.stack([c.astype(f32), l.astype(f32), hl_b], axis=1)         # (B, 3, H) one DMA
    smask = seq_mask.astype(f32)
    pades = jnp.pad(num_pades.astype(f32), ((0, 0), (0, NPP - NP), (0, 0)))   # (B, NPP, H)
    nmask = jnp.pad(mask_nums.astype(f32), ((0, 0), (0, NPAD - N)),
                    constant_values=1.0)                                 # (B, NPAD)

    def pad_b(x, value=0.0):
        if BP == B:
            return x
        pad = [(0, BP - B)] + [(0, 0)] * (x.ndim - 1)
        return jnp.pad(x, pad, constant_values=value)

    cl_p, enc_p, smask_p = pad_b(cl), pad_b(enc_bsh), pad_b(smask)
    pades_p, nmask_p = pad_b(pades), pad_b(nmask, 1.0)
    if SP != S:
        enc_p = jnp.pad(enc_p, ((0, 0), (0, SP - S), (0, 0)))
        smask_p = jnp.pad(smask_p, ((0, 0), (0, SP - S)), constant_values=1.0)

    # ---- fused / repacked weights (plain JAX, once per call) ----
    Wc_gate = jnp.concatenate([params["Wl"], params["Wlg"], params["Wr_c"], params["Wrg_c"]],
                              axis=1).astype(cdt)                        # (H, 4H)
    bc_gate = jnp.concatenate([params["bl"], params["blg"], params["br"], params["brg"]],
                              axis=1).astype(f32)                        # (1, 4H)
    Wl_gate = jnp.concatenate([params["Wr_l"], params["Wrg_l"]], axis=1).astype(cdt)   # (H, 2H)
    Wa_hid = params["Wa_hid"].astype(cdt)
    Wa_enc = params["Wa_enc"].astype(cdt)
    ba = params["ba"].astype(f32)
    Ws_row = params["Ws"].T.astype(f32)                                  # (1, H)
    bs = params["bs"].astype(f32)                                        # (1, 1)
    # fused leaf weight: [Score.attn node|ctx part ; ops node|ctx part]  (2H, H+OP)
    W_leaf = jnp.concatenate(
        [jnp.concatenate([params["Wsa_node"], params["Wsa_ctx"]], axis=0),
         jnp.concatenate([params["Wop_node"], params["Wop_ctx"]], axis=0)], axis=1).astype(cdt)
    b_leaf = jnp.concatenate([params["bsa"], params["bop"]], axis=1).astype(f32)       # (1, H+OP)
    Wsa_emb = params["Wsa_emb"].astype(cdt)
    Wss_row = params["Wss"].T.astype(f32)                                # (1, H)
    # hoisted batch-invariant projection: embedding_weight @ Wsa_emb
    emb_proj = jnp.dot(emb_w[0].astype(cdt), params["Wsa_emb"].astype(cdt),
                       preferred_element_type=f32)                       # (IN_SZ, H)

    in_specs, out_specs = _make_specs(TB, SP, H, NPP, NPAD, IN_SZ, OP)
    out_shape = (
        jax.ShapeDtypeStruct((BP, NPAD), f32),
        jax.ShapeDtypeStruct((BP, OP), f32),
        jax.ShapeDtypeStruct((BP, H), f32),
        jax.ShapeDtypeStruct((BP, H), f32),
    )
    num_score, op, node, ctx = pl.pallas_call(
        prediction_kernel,
        out_shape=out_shape,
        grid=(BP // TB,),
        in_specs=in_specs,
        out_specs=out_specs,
        compiler_params=pltpu.CompilerParams(dimension_semantics=("parallel",)),
    )(cl_p, enc_p, smask_p, pades_p, nmask_p,
      Wc_gate, bc_gate, Wl_gate,
      Wa_hid, Wa_enc, ba, Ws_row, bs,
      W_leaf, b_leaf, Wsa_emb, Wss_row, emb_proj)

    return (num_score[:B, :N], op[:B], node[:B, None, :], ctx[:B, None, :], emb_all)


def _reference_forward(params, c, l, has_left, encoder_outputs, num_pades, seq_mask, mask_nums):
    """Plain-JAX mirror of the PyTorch forward (eval mode) for validation."""
    B, H = c.shape
    emb_w = params["embedding_weight"]
    emb_all = jnp.concatenate([jnp.tile(emb_w, (B, 1, 1)), num_pades], axis=1)
    g_none = jnp.tanh(c @ params["Wl"] + params["bl"])
    t_none = jax.nn.sigmoid(c @ params["Wlg"] + params["blg"])
    g_left = jnp.tanh(l @ params["Wr_l"] + c @ params["Wr_c"] + params["br"])
    t_left = jax.nn.sigmoid(l @ params["Wrg_l"] + c @ params["Wrg_c"] + params["brg"])
    node = jnp.where(has_left[:, None] > 0.5, g_left * t_left, g_none * t_none)   # (B, H)
    enc = jnp.transpose(encoder_outputs, (1, 0, 2))                               # (B, S, H)
    feat = jnp.tanh(node[:, None, :] @ params["Wa_hid"] + enc @ params["Wa_enc"] + params["ba"])
    energies = (feat @ params["Ws"])[..., 0] + params["bs"][0, 0]                  # (B, S)
    energies = jnp.where(seq_mask > 0.5, NEG_BIG, energies)
    attn = jax.nn.softmax(energies, axis=1)
    context = jnp.einsum("bs,bsh->bh", attn, enc)
    energy = jnp.tanh(node[:, None, :] @ params["Wsa_node"] + context[:, None, :] @ params["Wsa_ctx"]
                      + emb_all @ params["Wsa_emb"] + params["bsa"])
    nscore = (energy @ params["Wss"])[..., 0]
    nscore = jnp.where(mask_nums > 0.5, NEG_BIG, nscore)
    op = node @ params["Wop_node"] + context @ params["Wop_ctx"] + params["bop"]
    return nscore, op, node[:, None, :], context[:, None, :], emb_all


if __name__ == "__main__":
    B, S, H, IN_SZ, NP, OP = 2, 8, 32, 4, 3, 5
    N = IN_SZ + NP

    key = jax.random.PRNGKey(0)
    keys = iter(jax.random.split(key, 64))
    nrm = lambda shape, s=0.1: (s * jax.random.normal(next(keys), shape)).astype(jnp.float32)

    params = {
        "embedding_weight": nrm((1, IN_SZ, H), 1.0),
        "Wl": nrm((H, H)), "bl": nrm((1, H)),
        "Wlg": nrm((H, H)), "blg": nrm((1, H)),
        "Wr_l": nrm((H, H)), "Wr_c": nrm((H, H)), "br": nrm((1, H)),
        "Wrg_l": nrm((H, H)), "Wrg_c": nrm((H, H)), "brg": nrm((1, H)),
        "Wa_hid": nrm((H, H)), "Wa_enc": nrm((H, H)), "ba": nrm((1, H)),
        "Ws": nrm((H, 1)), "bs": nrm((1, 1)),
        "Wsa_node": nrm((H, H)), "Wsa_ctx": nrm((H, H)), "Wsa_emb": nrm((H, H)), "bsa": nrm((1, H)),
        "Wss": nrm((H, 1)),
        "Wop_node": nrm((H, OP)), "Wop_ctx": nrm((H, OP)), "bop": nrm((1, OP)),
    }

    # inputs (simulating node_stacks / left_childs resolution — host-side Python glue)
    padding_hidden = nrm((1, H), 1.0)
    node_emb = nrm((H,), 1.0)     # stack top for batch element 1
    left_emb = nrm((H,), 1.0)     # left child for batch element 1
    node_stacks = [[], ["nonempty"]]            # element 0 empty -> padding_hidden
    left_childs = [None, left_emb]              # element 0 has no left child

    c_rows, l_rows, hl_rows = [], [], []
    for st, lch in zip(node_stacks, left_childs):
        c_rows.append(padding_hidden[0] if len(st) == 0 else node_emb)
        if lch is None:
            l_rows.append(jnp.zeros((H,), jnp.float32)); hl_rows.append(0.0)
        else:
            l_rows.append(lch); hl_rows.append(1.0)
    c = jnp.stack(c_rows)                        # (B, H)
    l = jnp.stack(l_rows)                        # (B, H)
    has_left = jnp.array(hl_rows, jnp.float32)   # (B,)

    encoder_outputs = nrm((S, B, H), 1.0)        # PyTorch layout [S, B, H]
    num_pades = nrm((B, NP, H), 1.0)
    seq_mask = jnp.zeros((B, S), jnp.float32).at[0, S - 1].set(1.0)
    mask_nums = jnp.zeros((B, N), jnp.float32).at[1, N - 1].set(1.0)

    refs = _reference_forward(params, c, l, has_left, encoder_outputs, num_pades, seq_mask, mask_nums)

    # f32 MXU operands
    outs = prediction_forward(params, c, l, has_left, encoder_outputs, num_pades, seq_mask, mask_nums)
    outs = jax.block_until_ready(outs)
    for o, r in zip(outs, refs):
        assert jnp.allclose(o, r, rtol=1e-2, atol=1e-2), "f32 kernel mismatch vs reference"

    # bf16 MXU operands (f32 accumulation / softmax) — looser tolerance
    outs_bf = prediction_forward(params, c, l, has_left, encoder_outputs, num_pades, seq_mask,
                                 mask_nums, use_bf16=True)
    outs_bf = jax.block_until_ready(outs_bf)
    for o, r in zip(outs_bf, refs):
        assert jnp.allclose(o.astype(jnp.float32), r, rtol=6e-2, atol=6e-2), \
            "bf16 kernel mismatch vs reference"

    print("KERNEL_OK")
</pallas_src>

<mosaic_0001>
module attributes {stable_mosaic.version = 11 : i64} {
  func.func @prediction_kernel(%arg0: i32, %arg1: memref<8x3x32xf32, #tpu.memory_space<vmem>>, %arg2: memref<8x8x32xf32, #tpu.memory_space<vmem>>, %arg3: memref<8x8xf32, #tpu.memory_space<vmem>>, %arg4: memref<8x8x32xf32, #tpu.memory_space<vmem>>, %arg5: memref<8x12xf32, #tpu.memory_space<vmem>>, %arg6: memref<32x128xf32, #tpu.memory_space<vmem>>, %arg7: memref<1x128xf32, #tpu.memory_space<vmem>>, %arg8: memref<32x64xf32, #tpu.memory_space<vmem>>, %arg9: memref<32x32xf32, #tpu.memory_space<vmem>>, %arg10: memref<32x32xf32, #tpu.memory_space<vmem>>, %arg11: memref<1x32xf32, #tpu.memory_space<vmem>>, %arg12: memref<1x32xf32, #tpu.memory_space<vmem>>, %arg13: memref<1x1xf32, #tpu.memory_space<vmem>>, %arg14: memref<64x37xf32, #tpu.memory_space<vmem>>, %arg15: memref<1x37xf32, #tpu.memory_space<vmem>>, %arg16: memref<32x32xf32, #tpu.memory_space<vmem>>, %arg17: memref<1x32xf32, #tpu.memory_space<vmem>>, %arg18: memref<4x32xf32, #tpu.memory_space<vmem>>, %arg19: memref<8x12xf32, #tpu.memory_space<vmem>>, %arg20: memref<8x5xf32, #tpu.memory_space<vmem>>, %arg21: memref<8x32xf32, #tpu.memory_space<vmem>>, %arg22: memref<8x32xf32, #tpu.memory_space<vmem>>) attributes {dimension_semantics = [#tpu.dimension_semantics<parallel>], iteration_bounds = array<i64: 1>, scalar_prefetch = 0 : i64, scratch_operands = 0 : i64, tpu.core_type = #tpu.core_type<tc>, window_params = [{transform_indices = @transform_0, window_bounds = array<i64: 8, 3, 32>}, {transform_indices = @transform_1, window_bounds = array<i64: 8, 8, 32>}, {transform_indices = @transform_2, window_bounds = array<i64: 8, 8>}, {transform_indices = @transform_3, window_bounds = array<i64: 8, 8, 32>}, {transform_indices = @transform_4, window_bounds = array<i64: 8, 12>}, {pipeline_mode = #tpu.pipeline_mode<synchronous>, transform_indices = @transform_5, window_bounds = array<i64: 32, 128>}, {pipeline_mode = #tpu.pipeline_mode<synchronous>, transform_indices = @transform_6, window_bounds = array<i64: 1, 128>}, {pipeline_mode = #tpu.pipeline_mode<synchronous>, transform_indices = @transform_7, window_bounds = array<i64: 32, 64>}, {pipeline_mode = #tpu.pipeline_mode<synchronous>, transform_indices = @transform_8, window_bounds = array<i64: 32, 32>}, {pipeline_mode = #tpu.pipeline_mode<synchronous>, transform_indices = @transform_9, window_bounds = array<i64: 32, 32>}, {pipeline_mode = #tpu.pipeline_mode<synchronous>, transform_indices = @transform_10, window_bounds = array<i64: 1, 32>}, {pipeline_mode = #tpu.pipeline_mode<synchronous>, transform_indices = @transform_11, window_bounds = array<i64: 1, 32>}, {pipeline_mode = #tpu.pipeline_mode<synchronous>, transform_indices = @transform_12, window_bounds = array<i64: 1, 1>}, {pipeline_mode = #tpu.pipeline_mode<synchronous>, transform_indices = @transform_13, window_bounds = array<i64: 64, 37>}, {pipeline_mode = #tpu.pipeline_mode<synchronous>, transform_indices = @transform_14, window_bounds = array<i64: 1, 37>}, {pipeline_mode = #tpu.pipeline_mode<synchronous>, transform_indices = @transform_15, window_bounds = array<i64: 32, 32>}, {pipeline_mode = #tpu.pipeline_mode<synchronous>, transform_indices = @transform_16, window_bounds = array<i64: 1, 32>}, {pipeline_mode = #tpu.pipeline_mode<synchronous>, transform_indices = @transform_17, window_bounds = array<i64: 4, 32>}, {transform_indices = @transform_18, window_bounds = array<i64: 8, 12>}, {transform_indices = @transform_19, window_bounds = array<i64: 8, 5>}, {transform_indices = @transform_20, window_bounds = array<i64: 8, 32>}, {transform_indices = @transform_21, window_bounds = array<i64: 8, 32>}]} {
    %c0 = arith.constant 0 : index
    %c0_0 = arith.constant 0 : index
    %c0_1 = arith.constant 0 : index
    %0 = vector.load %arg1[%c0, %c0_0, %c0_1] : memref<8x3x32xf32, #tpu.memory_space<vmem>>, vector<8x1x32xf32>
    %1 = vector.shape_cast %0 : vector<8x1x32xf32> to vector<8x32xf32>
    %c0_2 = arith.constant 0 : index
    %c1 = arith.constant 1 : index
    %c0_3 = arith.constant 0 : index
    %2 = vector.load %arg1[%c0_2, %c1, %c0_3] : memref<8x3x32xf32, #tpu.memory_space<vmem>>, vector<8x1x32xf32>
    %3 = vector.shape_cast %2 : vector<8x1x32xf32> to vector<8x32xf32>
    %c0_4 = arith.constant 0 : index
    %c2 = arith.constant 2 : index
    %c0_5 = arith.constant 0 : index
    %4 = vector.load %arg1[%c0_4, %c2, %c0_5] : memref<8x3x32xf32, #tpu.memory_space<vmem>>, vector<8x1x32xf32>
    %5 = vector.shape_cast %4 : vector<8x1x32xf32> to vector<8x32xf32>
    %c0_6 = arith.constant 0 : index
    %c0_7 = arith.constant 0 : index
    %6 = vector.load %arg6[%c0_6, %c0_7] : memref<32x128xf32, #tpu.memory_space<vmem>>, vector<32x128xf32>
    %cst = arith.constant dense<0.000000e+00> : vector<8x128xf32>
    %7 = tpu.matmul %1, %6, %cst {dimension_numbers = #tpu.dot_dimension_numbers<[1], [0], [0], [1], [0, 0, 1, 1], [], []>} : vector<8x32xf32>, vector<32x128xf32>, vector<8x128xf32> -> vector<8x128xf32>
    %c0_8 = arith.constant 0 : index
    %c0_9 = arith.constant 0 : index
    %8 = vector.load %arg7[%c0_8, %c0_9] : memref<1x128xf32, #tpu.memory_space<vmem>>, vector<1x128xf32>
    %9 = vector.broadcast %8 : vector<1x128xf32> to vector<8x128xf32>
    %10 = arith.addf %7, %9 : vector<8x128xf32>
    %c0_10 = arith.constant 0 : index
    %c0_11 = arith.constant 0 : index
    %11 = vector.load %arg8[%c0_10, %c0_11] : memref<32x64xf32, #tpu.memory_space<vmem>>, vector<32x64xf32>
    %cst_12 = arith.constant dense<0.000000e+00> : vector<8x64xf32>
    %12 = tpu.matmul %3, %11, %cst_12 {dimension_numbers = #tpu.dot_dimension_numbers<[1], [0], [0], [1], [0, 0, 1, 1], [], []>} : vector<8x32xf32>, vector<32x64xf32>, vector<8x64xf32> -> vector<8x64xf32>
    %13 = vector.extract_strided_slice %10 {offsets = [0, 0], sizes = [8, 32], strides = [1, 1]} : vector<8x128xf32> to vector<8x32xf32>
    %14 = math.tanh %13 : vector<8x32xf32>
    %15 = vector.extract_strided_slice %10 {offsets = [0, 32], sizes = [8, 32], strides = [1, 1]} : vector<8x128xf32> to vector<8x32xf32>
    %16 = arith.negf %15 : vector<8x32xf32>
    %17 = math.exp %16 : vector<8x32xf32>
    %cst_13 = arith.constant 1.000000e+00 : f32
    %18 = vector.broadcast %cst_13 : f32 to vector<8x32xf32>
    %19 = arith.addf %18, %17 : vector<8x32xf32>
    %20 = arith.divf %18, %19 : vector<8x32xf32>
    %21 = vector.extract_strided_slice %10 {offsets = [0, 64], sizes = [8, 32], strides = [1, 1]} : vector<8x128xf32> to vector<8x32xf32>
    %22 = vector.extract_strided_slice %12 {offsets = [0, 0], sizes = [8, 32], strides = [1, 1]} : vector<8x64xf32> to vector<8x32xf32>
    %23 = arith.addf %21, %22 : vector<8x32xf32>
    %24 = math.tanh %23 : vector<8x32xf32>
    %25 = vector.extract_strided_slice %10 {offsets = [0, 96], sizes = [8, 32], strides = [1, 1]} : vector<8x128xf32> to vector<8x32xf32>
    %26 = vector.extract_strided_slice %12 {offsets = [0, 32], sizes = [8, 32], strides = [1, 1]} : vector<8x64xf32> to vector<8x32xf32>
    %27 = arith.addf %25, %26 : vector<8x32xf32>
    %28 = arith.negf %27 : vector<8x32xf32>
    %29 = math.exp %28 : vector<8x32xf32>
    %cst_14 = arith.constant 1.000000e+00 : f32
    %30 = vector.broadcast %cst_14 : f32 to vector<8x32xf32>
    %31 = arith.addf %30, %29 : vector<8x32xf32>
    %32 = arith.divf %30, %31 : vector<8x32xf32>
    %cst_15 = arith.constant 5.000000e-01 : f32
    %33 = vector.broadcast %cst_15 : f32 to vector<8x32xf32>
    %34 = arith.cmpf ogt, %5, %33 : vector<8x32xf32>
    %35 = arith.mulf %24, %32 : vector<8x32xf32>
    %36 = arith.mulf %14, %20 : vector<8x32xf32>
    %37 = arith.select %34, %35, %36 : vector<8x32xi1>, vector<8x32xf32>
    %c0_16 = arith.constant 0 : index
    %c0_17 = arith.constant 0 : index
    %c0_18 = arith.constant 0 : index
    %38 = vector.load %arg2[%c0_16, %c0_17, %c0_18] : memref<8x8x32xf32, #tpu.memory_space<vmem>>, vector<8x8x32xf32>
    %c0_19 = arith.constant 0 : index
    %c0_20 = arith.constant 0 : index
    %39 = vector.load %arg9[%c0_19, %c0_20] : memref<32x32xf32, #tpu.memory_space<vmem>>, vector<32x32xf32>
    %cst_21 = arith.constant dense<0.000000e+00> : vector<8x32xf32>
    %40 = tpu.matmul %37, %39, %cst_21 {dimension_numbers = #tpu.dot_dimension_numbers<[1], [0], [0], [1], [0, 0, 1, 1], [], []>} : vector<8x32xf32>, vector<32x32xf32>, vector<8x32xf32> -> vector<8x32xf32>
    %c0_22 = arith.constant 0 : index
    %c0_23 = arith.constant 0 : index
    %41 = vector.load %arg11[%c0_22, %c0_23] : memref<1x32xf32, #tpu.memory_space<vmem>>, vector<1x32xf32>
    %42 = vector.broadcast %41 : vector<1x32xf32> to vector<8x32xf32>
    %43 = arith.addf %40, %42 : vector<8x32xf32>
    %44 = vector.shape_cast %38 : vector<8x8x32xf32> to vector<64x32xf32>
    %c0_24 = arith.constant 0 : index
    %c0_25 = arith.constant 0 : index
    %45 = vector.load %arg10[%c0_24, %c0_25] : memref<32x32xf32, #tpu.memory_space<vmem>>, vector<32x32xf32>
    %cst_26 = arith.constant dense<0.000000e+00> : vector<64x32xf32>
    %46 = tpu.matmul %44, %45, %cst_26 {dimension_numbers = #tpu.dot_dimension_numbers<[1], [0], [0], [1], [0, 0, 1, 1], [], []>} : vector<64x32xf32>, vector<32x32xf32>, vector<64x32xf32> -> vector<64x32xf32>
    %47 = vector.shape_cast %46 : vector<64x32xf32> to vector<8x8x32xf32>
    %48 = vector.shape_cast %43 : vector<8x32xf32> to vector<8x1x32xf32>
    %49 = vector.broadcast %48 : vector<8x1x32xf32> to vector<8x8x32xf32>
    %50 = arith.addf %49, %47 : vector<8x8x32xf32>
    %51 = math.tanh %50 : vector<8x8x32xf32>
    %c0_27 = arith.constant 0 : index
    %c0_28 = arith.constant 0 : index
    %52 = vector.load %arg12[%c0_27, %c0_28] : memref<1x32xf32, #tpu.memory_space<vmem>>, vector<1x32xf32>
    %53 = vector.shape_cast %52 : vector<1x32xf32> to vector<1x1x32xf32>
    %54 = vector.broadcast %53 : vector<1x1x32xf32> to vector<8x8x32xf32>
    %55 = arith.mulf %51, %54 : vector<8x8x32xf32>
    %cst_29 = arith.constant dense<0.000000e+00> : vector<8x8xf32>
    %56 = vector.multi_reduction <add>, %55, %cst_29 [2] : vector<8x8x32xf32> to vector<8x8xf32>
    %c0_30 = arith.constant 0 : index
    %c0_31 = arith.constant 0 : index
    %57 = vector.load %arg13[%c0_30, %c0_31] : memref<1x1xf32, #tpu.memory_space<vmem>>, vector<1x1xf32>
    %58 = vector.broadcast %57 : vector<1x1xf32> to vector<8x8xf32>
    %59 = arith.addf %56, %58 : vector<8x8xf32>
    %c0_32 = arith.constant 0 : index
    %c0_33 = arith.constant 0 : index
    %60 = vector.load %arg3[%c0_32, %c0_33] : memref<8x8xf32, #tpu.memory_space<vmem>>, vector<8x8xf32>
    %cst_34 = arith.constant 5.000000e-01 : f32
    %61 = vector.broadcast %cst_34 : f32 to vector<8x8xf32>
    %62 = arith.cmpf ogt, %60, %61 : vector<8x8xf32>
    %cst_35 = arith.constant -9.99999995E+11 : f32
    %63 = vector.broadcast %cst_35 : f32 to vector<8x8xf32>
    %64 = arith.select %62, %63, %59 : vector<8x8xi1>, vector<8x8xf32>
    %cst_36 = arith.constant dense<0xFF800000> : vector<8xf32>
    %65 = vector.multi_reduction <maximumf>, %64, %cst_36 [1] : vector<8x8xf32> to vector<8xf32>
    %66 = vector.shape_cast %65 : vector<8xf32> to vector<8x1xf32>
    %67 = vector.broadcast %66 : vector<8x1xf32> to vector<8x8xf32>
    %68 = arith.subf %64, %67 : vector<8x8xf32>
    %69 = math.exp %68 : vector<8x8xf32>
    %cst_37 = arith.constant dense<0.000000e+00> : vector<8xf32>
    %70 = vector.multi_reduction <add>, %69, %cst_37 [1] : vector<8x8xf32> to vector<8xf32>
    %71 = vector.shape_cast %70 : vector<8xf32> to vector<8x1xf32>
    %72 = tpu.reciprocal %71 {approx = true} : vector<8x1xf32> -> vector<8x1xf32>
    %73 = vector.broadcast %72 : vector<8x1xf32> to vector<8x8xf32>
    %74 = arith.mulf %69, %73 : vector<8x8xf32>
    %75 = vector.shape_cast %74 : vector<8x8xf32> to vector<8x1x8xf32>
    "tpu.trace_start"() <{level = 10 : i32, message = "bqs,bsh->bqh"}> : () -> ()
    %cst_38 = arith.constant dense<0.000000e+00> : vector<8x1x32xf32>
    %76 = tpu.matmul %75, %38, %cst_38 {dimension_numbers = #tpu.dot_dimension_numbers<[2], [1], [1], [2], [0, 0, 0, 1, 1, 2], [0], [0]>} : vector<8x1x8xf32>, vector<8x8x32xf32>, vector<8x1x32xf32> -> vector<8x1x32xf32>
    "tpu.trace_stop"() : () -> ()
    %77 = vector.shape_cast %76 : vector<8x1x32xf32> to vector<8x32xf32>
    %78 = tpu.concatenate %37, %77 in 1 : vector<8x32xf32>, vector<8x32xf32> -> vector<8x64xf32>
    %c0_39 = arith.constant 0 : index
    %c0_40 = arith.constant 0 : index
    %79 = vector.load %arg14[%c0_39, %c0_40] : memref<64x37xf32, #tpu.memory_space<vmem>>, vector<64x37xf32>
    %cst_41 = arith.constant dense<0.000000e+00> : vector<8x37xf32>
    %80 = tpu.matmul %78, %79, %cst_41 {dimension_numbers = #tpu.dot_dimension_numbers<[1], [0], [0], [1], [0, 0, 1, 1], [], []>} : vector<8x64xf32>, vector<64x37xf32>, vector<8x37xf32> -> vector<8x37xf32>
    %c0_42 = arith.constant 0 : index
    %c0_43 = arith.constant 0 : index
    %81 = vector.load %arg15[%c0_42, %c0_43] : memref<1x37xf32, #tpu.memory_space<vmem>>, vector<1x37xf32>
    %82 = vector.broadcast %81 : vector<1x37xf32> to vector<8x37xf32>
    %83 = arith.addf %80, %82 : vector<8x37xf32>
    %84 = vector.extract_strided_slice %83 {offsets = [0, 0], sizes = [8, 32], strides = [1, 1]} : vector<8x37xf32> to vector<8x32xf32>
    %85 = vector.extract_strided_slice %83 {offsets = [0, 32], sizes = [8, 5], strides = [1, 1]} : vector<8x37xf32> to vector<8x5xf32>
    %86 = vector.shape_cast %84 : vector<8x32xf32> to vector<8x1x32xf32>
    %c0_44 = arith.constant 0 : index
    %c0_45 = arith.constant 0 : index
    %87 = vector.load %arg17[%c0_44, %c0_45] : memref<1x32xf32, #tpu.memory_space<vmem>>, vector<1x32xf32>
    %88 = vector.shape_cast %87 : vector<1x32xf32> to vector<1x1x32xf32>
    %c0_46 = arith.constant 0 : index
    %c0_47 = arith.constant 0 : index
    %89 = vector.load %arg18[%c0_46, %c0_47] : memref<4x32xf32, #tpu.memory_space<vmem>>, vector<4x32xf32>
    %90 = vector.shape_cast %89 : vector<4x32xf32> to vector<1x4x32xf32>
    %91 = vector.broadcast %86 : vector<8x1x32xf32> to vector<8x4x32xf32>
    %92 = vector.broadcast %90 : vector<1x4x32xf32> to vector<8x4x32xf32>
    %93 = arith.addf %91, %92 : vector<8x4x32xf32>
    %94 = math.tanh %93 : vector<8x4x32xf32>
    %95 = vector.broadcast %88 : vector<1x1x32xf32> to vector<8x4x32xf32>
    %96 = arith.mulf %94, %95 : vector<8x4x32xf32>
    %cst_48 = arith.constant dense<0.000000e+00> : vector<8x4xf32>
    %97 = vector.multi_reduction <add>, %96, %cst_48 [2] : vector<8x4x32xf32> to vector<8x4xf32>
    %c0_49 = arith.constant 0 : index
    %c0_50 = arith.constant 0 : index
    %c0_51 = arith.constant 0 : index
    %98 = vector.load %arg4[%c0_49, %c0_50, %c0_51] : memref<8x8x32xf32, #tpu.memory_space<vmem>>, vector<8x8x32xf32>
    %99 = vector.shape_cast %98 : vector<8x8x32xf32> to vector<64x32xf32>
    %c0_52 = arith.constant 0 : index
    %c0_53 = arith.constant 0 : index
    %100 = vector.load %arg16[%c0_52, %c0_53] : memref<32x32xf32, #tpu.memory_space<vmem>>, vector<32x32xf32>
    %cst_54 = arith.constant dense<0.000000e+00> : vector<64x32xf32>
    %101 = tpu.matmul %99, %100, %cst_54 {dimension_numbers = #tpu.dot_dimension_numbers<[1], [0], [0], [1], [0, 0, 1, 1], [], []>} : vector<64x32xf32>, vector<32x32xf32>, vector<64x32xf32> -> vector<64x32xf32>
    %102 = vector.shape_cast %101 : vector<64x32xf32> to vector<8x8x32xf32>
    %103 = vector.broadcast %86 : vector<8x1x32xf32> to vector<8x8x32xf32>
    %104 = arith.addf %103, %102 : vector<8x8x32xf32>
    %105 = math.tanh %104 : vector<8x8x32xf32>
    %106 = vector.broadcast %88 : vector<1x1x32xf32> to vector<8x8x32xf32>
    %107 = arith.mulf %105, %106 : vector<8x8x32xf32>
    %cst_55 = arith.constant dense<0.000000e+00> : vector<8x8xf32>
    %108 = vector.multi_reduction <add>, %107, %cst_55 [2] : vector<8x8x32xf32> to vector<8x8xf32>
    %109 = tpu.concatenate %97, %108 in 1 : vector<8x4xf32>, vector<8x8xf32> -> vector<8x12xf32>
    %c0_56 = arith.constant 0 : index
    %c0_57 = arith.constant 0 : index
    %110 = vector.load %arg5[%c0_56, %c0_57] : memref<8x12xf32, #tpu.memory_space<vmem>>, vector<8x12xf32>
    %cst_58 = arith.constant 5.000000e-01 : f32
    %111 = vector.broadcast %cst_58 : f32 to vector<8x12xf32>
    %112 = arith.cmpf ogt, %110, %111 : vector<8x12xf32>
    %cst_59 = arith.constant -9.99999995E+11 : f32
    %113 = vector.broadcast %cst_59 : f32 to vector<8x12xf32>
    %114 = arith.select %112, %113, %109 : vector<8x12xi1>, vector<8x12xf32>
    %c0_60 = arith.constant 0 : index
    %c0_61 = arith.constant 0 : index
    %115 = vector.load %arg19[%c0_60, %c0_61] : memref<8x12xf32, #tpu.memory_space<vmem>>, vector<8x12xf32>
    tpu.vector_store %arg19[%c0_60, %c0_61], %114 {strides = array<i32>} : memref<8x12xf32, #tpu.memory_space<vmem>>, vector<8x12xf32>,
    %c0_62 = arith.constant 0 : index
    %c0_63 = arith.constant 0 : index
    %116 = vector.load %arg20[%c0_62, %c0_63] : memref<8x5xf32, #tpu.memory_space<vmem>>, vector<8x5xf32>
    tpu.vector_store %arg20[%c0_62, %c0_63], %85 {strides = array<i32>} : memref<8x5xf32, #tpu.memory_space<vmem>>, vector<8x5xf32>,
    %c0_64 = arith.constant 0 : index
    %c0_65 = arith.constant 0 : index
    %117 = vector.load %arg21[%c0_64, %c0_65] : memref<8x32xf32, #tpu.memory_space<vmem>>, vector<8x32xf32>
    tpu.vector_store %arg21[%c0_64, %c0_65], %37 {strides = array<i32>} : memref<8x32xf32, #tpu.memory_space<vmem>>, vector<8x32xf32>,
    %c0_66 = arith.constant 0 : index
    %c0_67 = arith.constant 0 : index
    %118 = vector.load %arg22[%c0_66, %c0_67] : memref<8x32xf32, #tpu.memory_space<vmem>>, vector<8x32xf32>
    tpu.vector_store %arg22[%c0_66, %c0_67], %77 {strides = array<i32>} : memref<8x32xf32, #tpu.memory_space<vmem>>, vector<8x32xf32>,
    return
  }
  func.func @transform_0(%arg0: i32) -> (i32, i32, i32) {
    %c0_i32 = arith.constant 0 : i32
    %c0_i32_0 = arith.constant 0 : i32
    %c0_i32_1 = arith.constant 0 : i32
    return %arg0, %c0_i32, %c0_i32_0 : i32, i32, i32
  }
  func.func @transform_1(%arg0: i32) -> (i32, i32, i32) {
    %c0_i32 = arith.constant 0 : i32
    %c0_i32_0 = arith.constant 0 : i32
    %c0_i32_1 = arith.constant 0 : i32
    return %arg0, %c0_i32, %c0_i32_0 : i32, i32, i32
  }
  func.func @transform_2(%arg0: i32) -> (i32, i32) {
    %c0_i32 = arith.constant 0 : i32
    %c0_i32_0 = arith.constant 0 : i32
    return %arg0, %c0_i32 : i32, i32
  }
  func.func @transform_3(%arg0: i32) -> (i32, i32, i32) {
    %c0_i32 = arith.constant 0 : i32
    %c0_i32_0 = arith.constant 0 : i32
    %c0_i32_1 = arith.constant 0 : i32
    return %arg0, %c0_i32, %c0_i32_0 : i32, i32, i32
  }
  func.func @transform_4(%arg0: i32) -> (i32, i32) {
    %c0_i32 = arith.constant 0 : i32
    %c0_i32_0 = arith.constant 0 : i32
    return %arg0, %c0_i32 : i32, i32
  }
  func.func @transform_5(%arg0: i32) -> (i32, i32) {
    %c0_i32 = arith.constant 0 : i32
    %c0_i32_0 = arith.constant 0 : i32
    %c0_i32_1 = arith.constant 0 : i32
    return %c0_i32, %c0_i32_0 : i32, i32
  }
  func.func @transform_6(%arg0: i32) -> (i32, i32) {
    %c0_i32 = arith.constant 0 : i32
    %c0_i32_0 = arith.constant 0 : i32
    %c0_i32_1 = arith.constant 0 : i32
    return %c0_i32, %c0_i32_0 : i32, i32
  }
  func.func @transform_7(%arg0: i32) -> (i32, i32) {
    %c0_i32 = arith.constant 0 : i32
    %c0_i32_0 = arith.constant 0 : i32
    %c0_i32_1 = arith.constant 0 : i32
    return %c0_i32, %c0_i32_0 : i32, i32
  }
  func.func @transform_8(%arg0: i32) -> (i32, i32) {
    %c0_i32 = arith.constant 0 : i32
    %c0_i32_0 = arith.constant 0 : i32
    %c0_i32_1 = arith.constant 0 : i32
    return %c0_i32, %c0_i32_0 : i32, i32
  }
  func.func @transform_9(%arg0: i32) -> (i32, i32) {
    %c0_i32 = arith.constant 0 : i32
    %c0_i32_0 = arith.constant 0 : i32
    %c0_i32_1 = arith.constant 0 : i32
    return %c0_i32, %c0_i32_0 : i32, i32
  }
  func.func @transform_10(%arg0: i32) -> (i32, i32) {
    %c0_i32 = arith.constant 0 : i32
    %c0_i32_0 = arith.constant 0 : i32
    %c0_i32_1 = arith.constant 0 : i32
    return %c0_i32, %c0_i32_0 : i32, i32
  }
  func.func @transform_11(%arg0: i32) -> (i32, i32) {
    %c0_i32 = arith.constant 0 : i32
    %c0_i32_0 = arith.constant 0 : i32
    %c0_i32_1 = arith.constant 0 : i32
    return %c0_i32, %c0_i32_0 : i32, i32
  }
  func.func @transform_12(%arg0: i32) -> (i32, i32) {
    %c0_i32 = arith.constant 0 : i32
    %c0_i32_0 = arith.constant 0 : i32
    %c0_i32_1 = arith.constant 0 : i32
    return %c0_i32, %c0_i32_0 : i32, i32
  }
  func.func @transform_13(%arg0: i32) -> (i32, i32) {
    %c0_i32 = arith.constant 0 : i32
    %c0_i32_0 = arith.constant 0 : i32
    %c0_i32_1 = arith.constant 0 : i32
    return %c0_i32, %c0_i32_0 : i32, i32
  }
  func.func @transform_14(%arg0: i32) -> (i32, i32) {
    %c0_i32 = arith.constant 0 : i32
    %c0_i32_0 = arith.constant 0 : i32
    %c0_i32_1 = arith.constant 0 : i32
    return %c0_i32, %c0_i32_0 : i32, i32
  }
  func.func @transform_15(%arg0: i32) -> (i32, i32) {
    %c0_i32 = arith.constant 0 : i32
    %c0_i32_0 = arith.constant 0 : i32
    %c0_i32_1 = arith.constant 0 : i32
    return %c0_i32, %c0_i32_0 : i32, i32
  }
  func.func @transform_16(%arg0: i32) -> (i32, i32) {
    %c0_i32 = arith.constant 0 : i32
    %c0_i32_0 = arith.constant 0 : i32
    %c0_i32_1 = arith.constant 0 : i32
    return %c0_i32, %c0_i32_0 : i32, i32
  }
  func.func @transform_17(%arg0: i32) -> (i32, i32) {
    %c0_i32 = arith.constant 0 : i32
    %c0_i32_0 = arith.constant 0 : i32
    %c0_i32_1 = arith.constant 0 : i32
    return %c0_i32, %c0_i32_0 : i32, i32
  }
  func.func @transform_18(%arg0: i32) -> (i32, i32) {
    %c0_i32 = arith.constant 0 : i32
    %c0_i32_0 = arith.constant 0 : i32
    return %arg0, %c0_i32 : i32, i32
  }
  func.func @transform_19(%arg0: i32) -> (i32, i32) {
    %c0_i32 = arith.constant 0 : i32
    %c0_i32_0 = arith.constant 0 : i32
    return %arg0, %c0_i32 : i32, i32
  }
  func.func @transform_20(%arg0: i32) -> (i32, i32) {
    %c0_i32 = arith.constant 0 : i32
    %c0_i32_0 = arith.constant 0 : i32
    return %arg0, %c0_i32 : i32, i32
  }
  func.func @transform_21(%arg0: i32) -> (i32, i32) {
    %c0_i32 = arith.constant 0 : i32
    %c0_i32_0 = arith.constant 0 : i32
    return %arg0, %c0_i32 : i32, i32
  }
}

</mosaic_0001>

<bundles_post_ra>
// kernel: tpu_custom_call.1
= control target key start
LH: loop header
LB: loop body
LE: loop exit
PB: predicated region body
PF: predicated region fallthrough
CT: control target
= control target key end

     0   :  { %s3658_s0 = inlined_call_operand.vmem [shape: f32[8,3,32], index: 0, kind: input, shape index: {}]   ;;  %s3659_s1 = inlined_call_operand.vmem [shape: f32[8,8,32], index: 1, kind: input, shape index: {}]   ;;  %s3660_s2 = inlined_call_operand.hbm [shape: f32[8,8], index: 2, kind: input, shape index: {}]   ;;  %s3661_s3 = inlined_call_operand.vmem [shape: f32[8,8,32], index: 3, kind: input, shape index: {}]   ;;  %s3662_s4 = inlined_call_operand.hbm [shape: f32[8,12], index: 4, kind: input, shape index: {}]   ;;  %s3663_s5 = inlined_call_operand.hbm [shape: f32[32,128], index: 5, kind: input, shape index: {}]   ;;  %s3664_s6 = inlined_call_operand.vmem [shape: f32[1,128], index: 6, kind: input, shape index: {}]   ;;  %s3665_s7 = inlined_call_operand.hbm [shape: f32[32,64], index: 7, kind: input, shape index: {}]   ;;  %s3666_s8 = inlined_call_operand.hbm [shape: f32[32,32], index: 8, kind: input, shape index: {}]   ;;  %s3667_s9 = inlined_call_operand.hbm [shape: f32[32,32], index: 9, kind: input, shape index: {}]   ;;  %s3668_s10 = inlined_call_operand.hbm [shape: f32[1,32], index: 10, kind: input, shape index: {}]   ;;  %s3669_s11 = inlined_call_operand.hbm [shape: f32[1,32], index: 11, kind: input, shape index: {}]   ;;  %s3670_s12 = inlined_call_operand.<no memory space> [shape: f32[1,1], index: 12, kind: input, shape index: {}]   ;;  %s3671_s13 = inlined_call_operand.vmem [shape: f32[64,37], index: 13, kind: input, shape index: {}]   ;;  %s3672_s14 = inlined_call_operand.vmem [shape: f32[1,37], index: 14, kind: input, shape index: {}]   ;;  %s3673_s15 = inlined_call_operand.vmem [shape: f32[32,32], index: 15, kind: input, shape index: {}]   ;;  %s3674_s16 = inlined_call_operand.vmem [shape: f32[1,32], index: 16, kind: input, shape index: {}]   ;;  %s3675_s17 = inlined_call_operand.vmem [shape: f32[4,32], index: 17, kind: input, shape index: {}]   ;;  %s3676_s18 = inlined_call_operand.hbm [shape: f32[8,12], index: 18, kind: output, shape index: {0}]   ;;  %s3677_s19 = inlined_call_operand.hbm [shape: f32[8,5], index: 19, kind: output, shape index: {1}]   ;;  %s3678_s20 = inlined_call_operand.hbm [shape: f32[8,32], index: 20, kind: output, shape index: {2}]   ;;  %s3679_s21 = inlined_call_operand.hbm [shape: f32[8,32], index: 21, kind: output, shape index: {3}]  }
   0x1   :  { %3686 = sst [smem:[#allocation31_spill]] %s3658_s0  ;;  %v27_v0 = vstv %s3670_s12 }
   0x2   :  { %3687 = sst [smem:[#allocation32_spill]] %s3659_s1  ;;  %28 = vst [vmem:[#allocation2] sm:$0x1] %v27_v0 }
   0x3   :  { %3688 = sst [smem:[#allocation33_spill]] %s3660_s2 }
   0x4   :  { %3689 = sst [smem:[#allocation34_spill]] %s3661_s3 }
   0x5   :  { %3690 = sst [smem:[#allocation35_spill]] %s3662_s4 }
   0x6   :  { %3691 = sst [smem:[#allocation36_spill]] %s3663_s5 }
   0x7   :  { %29 = vsyncpa [#allocation4], 0 }
   0x8   :  { %30 = vsyncpa [#allocation7], 0 }
   0x9   :  { %31 = vsyncpa [#allocation10], 0 }
   0xa   :  { %32 = vsyncpa [#allocation13], 0 }
   0xb   :  { %33 = vsyncpa [#allocation16], 0 }
   0xc   :  { %34 = vsyncpa [#allocation5], 0 }
   0xd   :  { %35 = vsyncpa [#allocation19], 0 }
   0xe   :  { %36 = vsyncpa [#allocation22], 0  ;;  %s2866_s26 = smov [#allocation6]   ;;  %s3692_s29 = sld [smem:[#allocation35_spill]] }
   0xf   :  { %s59_s27 = sshll.u32 %s2866_s26, 4  ;;  %s60_s27 = int_to_ptr.vmem [resolvable:$true] %s59_s27 }
  0x14   :  { %s2586_s0 = scalar_lea.hbm %s3692_s29, 128 }
  0x15   :  { %p2587_p0 = scmp.ne.s32.totalorder %s3692_s29, %s2586_s0  ;;  %p2590_p1 = scmp.lt.u32.totalorder %s2586_s0, %s3692_s29 }
  0x17   :  { %p2592_p2 = pnand %p2590_p1, %p2587_p0 }
  0x19   :  { %2595 = shalt.err (!%p2592_p2)
}
  0x1a   :  { %s2596_s22 = scalar_lea.vmem %s60_s27, 128  ;;  %p2601_p4 = scmp.lt.s32.totalorder %s60_s27, %s60_s27 }
  0x1b   :  { %p2597_p3 = scmp.ne.s32.totalorder %s60_s27, %s2596_s22  ;;  %p2602_p5 = scmp.lt.s32.totalorder %s2596_s22, %s2596_s22 }
  0x1d   :  { %p2603_p6 = por %p2602_p5, %p2601_p4 }
  0x1f   :  { %p2604_p7 = pnand %p2603_p6, %p2597_p3 }
  0x21   :  { %2607 = shalt.err (!%p2604_p7)
}
  0x22   :  { %62 = dma.hbm_to_vmem [thread:$0]  %s3692_s29, 128, %s60_s27, [#allocation7]  }
  0x23   :  { %s2867_s24 = smov [#allocation9]   ;;  %s2868_s25 = smov [#allocation12]  }
  0x24   :  { %s82_s2 = sshll.u32 %s2867_s24, 4  ;;  %s106_s26 = sshll.u32 %s2868_s25, 4  ;;  %s83_s2 = int_to_ptr.vmem [resolvable:$true] %s82_s2  ;;  %s107_s26 = int_to_ptr.vmem [resolvable:$true] %s106_s26 }
  0x25   :  { %s2608_s0 = scalar_lea.hbm %s3665_s7, 512 }
  0x26   :  { %p2609_p8 = scmp.ne.s32.totalorder %s3665_s7, %s2608_s0  ;;  %p2612_p9 = scmp.lt.u32.totalorder %s2608_s0, %s3665_s7 }
  0x28   :  { %p2614_p10 = pnand %p2612_p9, %p2609_p8 }
  0x2a   :  { %2617 = shalt.err (!%p2614_p10)
}
  0x2b   :  { %s2618_s27 = scalar_lea.vmem %s83_s2, 512  ;;  %p2623_p12 = scmp.lt.s32.totalorder %s83_s2, %s83_s2 }
  0x2c   :  { %p2619_p11 = scmp.ne.s32.totalorder %s83_s2, %s2618_s27  ;;  %p2624_p13 = scmp.lt.s32.totalorder %s2618_s27, %s2618_s27 }
  0x2e   :  { %p2625_p0 = por %p2624_p13, %p2623_p12 }
  0x30   :  { %p2626_p1 = pnand %p2625_p0, %p2619_p11 }
  0x32   :  { %2629 = shalt.err (!%p2626_p1)
}
  0x33   :  { %s2869_s29 = smov 128   ;;  %s2870_s22 = smov 8  }
  0x34   :  { %88 = dma.hbm_to_vmem [thread:$0]  %s3665_s7, 512, %s83_s2, [#allocation10], %s2869_s29, %s2869_s29, %s2870_s22  }
  0x35   :  { %s2630_s3 = scalar_lea.hbm %s3667_s9, 512 }
  0x36   :  { %p2631_p2 = scmp.ne.s32.totalorder %s3667_s9, %s2630_s3  ;;  %p2634_p3 = scmp.lt.u32.totalorder %s2630_s3, %s3667_s9 }
  0x38   :  { %p2636_p4 = pnand %p2634_p3, %p2631_p2 }
  0x3a   :  { %2639 = shalt.err (!%p2636_p4)
}
  0x3b   :  { %s2640_s12 = scalar_lea.vmem %s107_s26, 512  ;;  %p2645_p6 = scmp.lt.s32.totalorder %s107_s26, %s107_s26 }
  0x3c   :  { %p2641_p5 = scmp.ne.s32.totalorder %s107_s26, %s2640_s12  ;;  %p2646_p7 = scmp.lt.s32.totalorder %s2640_s12, %s2640_s12 }
  0x3e   :  { %p2647_p8 = por %p2646_p7, %p2645_p6 }
  0x40   :  { %p2648_p9 = pnand %p2647_p8, %p2641_p5 }
  0x42   :  { %2651 = shalt.err (!%p2648_p9)
}
  0x43   :  { %112 = dma.hbm_to_vmem [thread:$0]  %s3667_s9, 512, %s107_s26, [#allocation13], %s2869_s29, %s2869_s29, %s2870_s22  }
  0x44   :  { %s2871_s5 = smov [#allocation3]   ;;  %s2872_s23 = smov [#allocation8]  }
  0x45   :  { %s47_s27 = sshll.u32 %s2871_s5, 4  ;;  %s68_s1 = sshll.u32 %s2872_s23, 4  ;;  %s48_s27 = int_to_ptr.vmem [resolvable:$true] %s47_s27  ;;  %s69_s1 = int_to_ptr.vmem [resolvable:$true] %s68_s1 }
  0x46   :  { %s3693_s3 = sld [smem:[#allocation33_spill]] }
  0x4c   :  { %s2652_s28 = scalar_lea.hbm %s3693_s3, 128 }
  0x4d   :  { %p2653_p10 = scmp.ne.s32.totalorder %s3693_s3, %s2652_s28  ;;  %p2656_p11 = scmp.lt.u32.totalorder %s2652_s28, %s3693_s3 }
  0x4f   :  { %p2658_p12 = pnand %p2656_p11, %p2653_p10 }
  0x51   :  { %2661 = shalt.err (!%p2658_p12)
}
  0x52   :  { %s2662_s9 = scalar_lea.vmem %s48_s27, 128  ;;  %p2667_p0 = scmp.lt.s32.totalorder %s48_s27, %s48_s27 }
  0x53   :  { %p2663_p13 = scmp.ne.s32.totalorder %s48_s27, %s2662_s9  ;;  %p2668_p1 = scmp.lt.s32.totalorder %s2662_s9, %s2662_s9 }
  0x55   :  { %p2669_p2 = por %p2668_p1, %p2667_p0 }
  0x57   :  { %p2670_p3 = pnand %p2669_p2, %p2663_p13 }
  0x59   :  { %2673 = shalt.err (!%p2670_p3)
}
  0x5a   :  { %50 = dma.hbm_to_vmem [thread:$0]  %s3693_s3, 128, %s48_s27, [#allocation4]  }
  0x5b   :  { %s3694_s23 = sld [smem:[#allocation36_spill]] }
  0x61   :  { %s2674_s24 = scalar_lea.hbm %s3694_s23, 512 }
  0x62   :  { %p2675_p4 = scmp.ne.s32.totalorder %s3694_s23, %s2674_s24  ;;  %p2678_p5 = scmp.lt.u32.totalorder %s2674_s24, %s3694_s23 }
  0x64   :  { %p2680_p6 = pnand %p2678_p5, %p2675_p4 }
  0x66   :  { %2683 = shalt.err (!%p2680_p6)
}
  0x67   :  { %s2684_s30 = scalar_lea.vmem %s69_s1, 512  ;;  %p2689_p8 = scmp.lt.s32.totalorder %s69_s1, %s69_s1 }
  0x68   :  { %p2685_p7 = scmp.ne.s32.totalorder %s69_s1, %s2684_s30  ;;  %p2690_p9 = scmp.lt.s32.totalorder %s2684_s30, %s2684_s30 }
  0x6a   :  { %p2691_p10 = por %p2690_p9, %p2689_p8 }
  0x6c   :  { %p2692_p11 = pnand %p2691_p10, %p2685_p7 }
  0x6e   :  { %2695 = shalt.err (!%p2692_p11)
}
  0x6f   :  { %74 = dma.hbm_to_vmem [thread:$0]  %s3694_s23, 512, %s69_s1, [#allocation7], %s2869_s29, %s2869_s29, %s2870_s22  }
  0x70   :  { %s2873_s12 = smov [#allocation11]   ;;  %s2874_s26 = smov [#allocation14]  }
  0x71   :  { %s94_s9 = sshll.u32 %s2873_s12, 4  ;;  %s119_s7 = sshll.u32 %s2874_s26, 4  ;;  %s95_s9 = int_to_ptr.vmem [resolvable:$true] %s94_s9  ;;  %s120_s7 = int_to_ptr.vmem [resolvable:$true] %s119_s7 }
  0x72   :  { %s2696_s24 = scalar_lea.hbm %s3666_s8, 512 }
  0x73   :  { %p2697_p12 = scmp.ne.s32.totalorder %s3666_s8, %s2696_s24  ;;  %p2700_p13 = scmp.lt.u32.totalorder %s2696_s24, %s3666_s8 }
  0x75   :  { %p2702_p0 = pnand %p2700_p13, %p2697_p12 }
  0x77   :  { %2705 = shalt.err (!%p2702_p0)
}
  0x78   :  { %s2706_s1 = scalar_lea.vmem %s95_s9, 512  ;;  %p2711_p2 = scmp.lt.s32.totalorder %s95_s9, %s95_s9 }
  0x79   :  { %p2707_p1 = scmp.ne.s32.totalorder %s95_s9, %s2706_s1  ;;  %p2712_p3 = scmp.lt.s32.totalorder %s2706_s1, %s2706_s1 }
  0x7b   :  { %p2713_p4 = por %p2712_p3, %p2711_p2 }
  0x7d   :  { %p2714_p5 = pnand %p2713_p4, %p2707_p1 }
  0x7f   :  { %2717 = shalt.err (!%p2714_p5)
}
  0x80   :  { %100 = dma.hbm_to_vmem [thread:$0]  %s3666_s8, 512, %s95_s9, [#allocation10], %s2869_s29, %s2869_s29, %s2870_s22  }
  0x81   :  { %s2718_s12 = scalar_lea.hbm %s3668_s10, 16 }
  0x82   :  { %p2719_p6 = scmp.ne.s32.totalorder %s3668_s10, %s2718_s12  ;;  %p2722_p7 = scmp.lt.u32.totalorder %s2718_s12, %s3668_s10 }
  0x84   :  { %p2724_p8 = pnand %p2722_p7, %p2719_p6 }
  0x86   :  { %2727 = shalt.err (!%p2724_p8)
}
  0x87   :  { %s2728_s25 = scalar_lea.vmem %s120_s7, 16  ;;  %s2732_s28 = scalar_lea.vmem %s120_s7, 32 }
  0x88   :  { %p2729_p9 = scmp.ne.s32.totalorder %s120_s7, %s2728_s25  ;;  %p2733_p10 = scmp.lt.s32.totalorder %s120_s7, %s120_s7 }
  0x89   :  { %p2734_p11 = scmp.lt.s32.totalorder %s2732_s28, %s2728_s25 }
  0x8b   :  { %p2735_p12 = por %p2734_p11, %p2733_p10 }
  0x8d   :  { %p2736_p13 = pnand %p2735_p12, %p2729_p9 }
  0x8f   :  { %2739 = shalt.err (!%p2736_p13)
}
  0x90   :  { %122 = dma.hbm_to_vmem [thread:$0]  %s3668_s10, 16, %s120_s7, [#allocation13]  }
  0x91   :  { %s2875_s22 = smov [#allocation15]   ;;  %s2740_s1 = scalar_lea.hbm %s3669_s11, 16 }
  0x92   :  { %s129_s9 = sshll.u32 %s2875_s22, 4  ;;  %p2741_p0 = scmp.ne.s32.totalorder %s3669_s11, %s2740_s1  ;;  %s130_s9 = int_to_ptr.vmem [resolvable:$true] %s129_s9 }
  0x93   :  { %p2744_p1 = scmp.lt.u32.totalorder %s2740_s1, %s3669_s11 }
  0x95   :  { %p2746_p2 = pnand %p2744_p1, %p2741_p0 }
  0x97   :  { %2749 = shalt.err (!%p2746_p2)
}
  0x98   :  { %s2750_s12 = scalar_lea.vmem %s130_s9, 16  ;;  %s2754_s10 = scalar_lea.vmem %s130_s9, 32 }
  0x99   :  { %p2751_p3 = scmp.ne.s32.totalorder %s130_s9, %s2750_s12  ;;  %p2755_p4 = scmp.lt.s32.totalorder %s130_s9, %s130_s9 }
  0x9a   :  { %p2756_p5 = scmp.lt.s32.totalorder %s2754_s10, %s2750_s12 }
  0x9c   :  { %p2757_p6 = por %p2756_p5, %p2755_p4 }
  0x9e   :  { %p2758_p7 = pnand %p2757_p6, %p2751_p3 }
  0xa0   :  { %2761 = shalt.err (!%p2758_p7)
}
  0xa1   :  { %132 = dma.hbm_to_vmem [thread:$0]  %s3669_s11, 16, %s130_s9, [#allocation16]  }
  0xa2   :  { %2850 = dma.done.wait [#allocation4], 128  }
  0xa3   :  { %2851 = vsyncadd [#allocation4], 4294967168 }
  0xa4   :  { %2852 = dma.done.wait [#allocation7], 640  }
  0xa5   :  { %2853 = vsyncadd [#allocation7], 4294966656 }
  0xa6   :  { %2854 = dma.done.wait [#allocation10], 1024  }
  0xa7   :  { %2855 = vsyncadd [#allocation10], 4294966272 }
  0xa8   :  { %2856 = dma.done.wait [#allocation13], 528  }
  0xa9   :  { %2857 = vsyncadd [#allocation13], 4294966768 }
  0xaa   :  { %2858 = dma.done.wait [#allocation16], 16  }
  0xab   :  { %2859 = vsyncadd [#allocation16], 4294967280  ;;  %v2876_v1 = vmov 0.0|0.0   ;;  %vm2877_vm0 = vmmov 0   ;;  %v2878_v2 = vmov 0.0   ;;  %v193_v3 = vld [vmem:[#allocation8] sm:$0xff] }
  0xac   :  { %2453 = vmatprep.subr.bf16.mxu0 %v2876_v1  ;;  %2459 = vmatprep.subr.bf16.mxu1 %v2876_v1  ;;  %v194_v4 = vld [vmem:[#allocation8 + $0x8] sm:$0xff]  ;;  %v306_v5 = vld [vmem:[#allocation9] sm:$0xff]  ;;  %v195_v8 = vld [vmem:[#allocation8 + $0x10] sm:$0xff]  ;;  %vm213_vm1 = vcmask 1041409   ;;  %vm216_vm2 = vcmask 1042434   ;;  %vm219_vm3 = vcmask 1043459  }
  0xad   :  { %2329 = vmatprep.mubr.msk.f32.mxu0 %vm2877_vm0, %v2878_v2  ;;  %2340 = vmatprep.mubr.msk.f32.mxu1 %vm2877_vm0, %v2878_v2  ;;  %v2454_v6 = vpack.c.bf16 %v194_v4, %v193_v3  ;;  %v307_v7 = vld [vmem:[#allocation9 + $0x8] sm:$0xff]  ;;  %v196_v9 = vld [vmem:[#allocation8 + $0x18] sm:$0xff]  ;;  %v308_v11 = vld [vmem:[#allocation9 + $0x10] sm:$0xff]  ;;  %s3695_s5 = sld [smem:[#allocation31_spill]]  ;;  %vm222_vm4 = vcmask 1044484   ;;  %vm225_vm5 = vcmask 1045509  }
  0xae   :  { %v2460_v10 = vpack.c.bf16 %v307_v7, %v306_v5  ;;  %v309_v12 = vld [vmem:[#allocation9 + $0x18] sm:$0xff]  ;;  %v2457_v14 = vpack.c.bf16 %v196_v9, %v195_v8  ;;  %vm228_vm6 = vcmask 1046534   ;;  %vm231_vm7 = vcmask 1047559   ;;  %v2221_v59 = vld [vmem:[%s3664_s6] ss:$0 sm:$0xff]  ;;  %s2879_s27 = smov 64  }
  0xaf   :  { %2455 = vmatpush3.bf16.msra.mxu0 %v2454_v6  ;;  %v2463_v18 = vpack.c.bf16 %v309_v12, %v308_v11  ;;  %vm233_vm8 = vcmask 261120   ;;  %s2880_s3 = smov 96   ;;  %s3696_s10 = sld [smem:[#allocation32_spill]] }
  0xb0   :  { %2461 = vmatpush3.bf16.msra.mxu1 %v2460_v10  ;;  %2456 = vmatprep.subr.bf16.mxu0 %v2876_v1  ;;  %s3697_s9 = sld [smem:[#allocation34_spill]]  ;;  %s2883_s8 = smov 32  }
  0xb1   :  { %2462 = vmatprep.subr.bf16.mxu1 %v2876_v1 }
  0xb3   :  { %v169_v13 = vld [vmem:[%s3695_s5] sm:$0x1]  ;;  %v170_v15 = vld [vmem:[%s3695_s5 + $0x4] sm:$0x1]  ;;  %v171_v16 = vld [vmem:[%s3695_s5 + $0x8] sm:$0x1]  ;;  %2458 = vmatpush3.bf16.msra.mxu0 %v2457_v14 }
  0xb4   :  { %v172_v17 = vld [vmem:[%s3695_s5 + $0xc] sm:$0x1]  ;;  %v173_v19 = vld [vmem:[%s3695_s5 + $0x10] sm:$0x1]  ;;  %v174_v20 = vld [vmem:[%s3695_s5 + $0x14] sm:$0x1]  ;;  %2464 = vmatpush3.bf16.msra.mxu1 %v2463_v18  ;;  %2465 = vmatprep.subr.bf16.mxu0 %v2876_v1 }
  0xb5   :  { %v175_v21 = vld [vmem:[%s3695_s5 + $0x18] sm:$0x1]  ;;  %v176_v22 = vld [vmem:[%s3695_s5 + $0x1c] sm:$0x1]  ;;  %v212_v23 = vrot.slane %v170_v15, 7  ;;  %v215_v24 = vrot.slane %v171_v16, 6 }
  0xb6   :  { %v218_v25 = vrot.slane %v172_v17, 5  ;;  %v221_v26 = vrot.slane %v173_v19, 4  ;;  %v224_v27 = vrot.slane %v174_v20, 3  ;;  %v227_v28 = vrot.slane %v175_v21, 2  ;;  %v178_v31 = vld [vmem:[%s3695_s5 + $0x5] sm:$0x1] }
  0xb7   :  { %v230_v29 = vrot.slane %v176_v22, 1  ;;  %v214_v30 = vsel %vm213_vm1, %v212_v23, %v169_v13  ;;  %v179_v32 = vld [vmem:[%s3695_s5 + $0x9] sm:$0x1]  ;;  %v180_v33 = vld [vmem:[%s3695_s5 + $0xd] sm:$0x1]  ;;  %v318_v40 = vrot.slane %v178_v31, 7 }
  0xb8   :  { %v217_v34 = vsel %vm216_vm2, %v215_v24, %v214_v30  ;;  %v177_v35 = vld [vmem:[%s3695_s5 + $0x1] sm:$0x1]  ;;  %v181_v36 = vld [vmem:[%s3695_s5 + $0x11] sm:$0x1]  ;;  %v182_v37 = vld [vmem:[%s3695_s5 + $0x15] sm:$0x1] }
  0xb9   :  { %v220_v38 = vsel %vm219_vm3, %v218_v25, %v217_v34  ;;  %v183_v39 = vld [vmem:[%s3695_s5 + $0x19] sm:$0x1]  ;;  %v320_v41 = vrot.slane %v179_v32, 6  ;;  %v322_v42 = vrot.slane %v180_v33, 5  ;;  %v184_v44 = vld [vmem:[%s3695_s5 + $0x1d] sm:$0x1]  ;;  %v319_v47 = vsel %vm213_vm1, %v318_v40, %v177_v35 }
  0xba   :  { %v223_v43 = vsel %vm222_vm4, %v221_v26, %v220_v38  ;;  %v324_v45 = vrot.slane %v181_v36, 4  ;;  %v326_v48 = vrot.slane %v182_v37, 3  ;;  %v328_v51 = vrot.slane %v183_v39, 2  ;;  %v610_v13 = vld [vmem:[#allocation12] sm:$0xff]  ;;  %v611_v14 = vld [vmem:[#allocation12 + $0x8] sm:$0xff]  ;;  %v612_v22 = vld [vmem:[#allocation12 + $0x10] sm:$0xff] }
  0xbb   :  { %v226_v46 = vsel %vm225_vm5, %v224_v27, %v223_v43  ;;  %v321_v50 = vsel %vm216_vm2, %v320_v41, %v319_v47  ;;  %v330_v54 = vrot.slane %v184_v44, 1  ;;  %v2471_v15 = vpack.c.bf16 %v611_v14, %v610_v13  ;;  %v505_v16 = vld [vmem:[#allocation11] sm:$0xff]  ;;  %v506_v17 = vld [vmem:[#allocation11 + $0x8] sm:$0xff]  ;;  %v613_v23 = vld [vmem:[#allocation12 + $0x18] sm:$0xff] }
  0xbc   :  { %v229_v49 = vsel %vm228_vm6, %v227_v28, %v226_v46  ;;  %v323_v53 = vsel %vm219_vm3, %v322_v42, %v321_v50  ;;  %v2466_v20 = vpack.c.bf16 %v506_v17, %v505_v16  ;;  %v2475_v24 = vpack.c.bf16 %v613_v23, %v612_v22  ;;  %v507_v26 = vld [vmem:[#allocation11 + $0x10] sm:$0xff]  ;;  %v508_v27 = vld [vmem:[#allocation11 + $0x18] sm:$0xff]  ;;  %v3222_v35 = vld [vmem:[%s3696_s10 + $0x18] sm:$0xff] }
  0xbd   :  { %v232_v52 = vsel %vm231_vm7, %v230_v29, %v229_v49  ;;  %v325_v55 = vsel %vm222_vm4, %v324_v45, %v323_v53  ;;  %2472 = vmatprep.subr.bf16.mxu1 %v2471_v15  ;;  %v2469_v29 = vpack.c.bf16 %v508_v27, %v507_v26  ;;  %v497_v30 = vld [vmem:[%s3696_s10] sm:$0xff]  ;;  %v3203_v31 = vld [vmem:[%s3696_s10 + $0x8] sm:$0xff]  ;;  %v3213_v33 = vld [vmem:[%s3696_s10 + $0x10] sm:$0xff] }
  0xbe   :  { %2330 = vmatmul.mubr.msk.f32.vlgmr.msra.gmra.mrb[0].mxu0 %vm233_vm8, %v232_v52  ;;  %v327_v56 = vsel %vm225_vm5, %v326_v48, %v325_v55  ;;  %v3227_v36 = vld [vmem:[%s3696_s10 + $0x20] sm:$0xff]  ;;  %v3239_v39 = vld [vmem:[%s3696_s10 + $0x28] sm:$0xff]  ;;  %v3244_v40 = vld [vmem:[%s3696_s10 + $0x30] sm:$0xff] }
  0xbf   :  { %2351 = vmatprep.mubr.msk.f32.mxu0 %vm2877_vm0, %v2878_v2  ;;  %v329_v57 = vsel %vm228_vm6, %v328_v51, %v327_v56  ;;  %2467 = vmatpush3.bf16.msra.mxu0 %v2466_v20  ;;  %v3255_v42 = vld [vmem:[%s3696_s10 + $0x38] sm:$0xff]  ;;  %v187_v46 = vld [vmem:[%s3695_s5 + $0xa] sm:$0x1]  ;;  %v186_v47 = vld [vmem:[%s3695_s5 + $0x6] sm:$0x1] }
  0xc0   :  { %v331_v58 = vsel %vm231_vm7, %v330_v54, %v329_v57  ;;  %2468 = vmatprep.subr.bf16.mxu0 %v2876_v1  ;;  %v185_v49 = vld [vmem:[%s3695_s5 + $0x2] sm:$0x1]  ;;  %vm425_vm9 = vcmp.gt.f32.partialorder %v187_v46, 0.5  ;;  %v188_v50 = vld [vmem:[%s3695_s5 + $0xe] sm:$0x1]  ;;  %vm424_vm10 = vcmp.gt.f32.partialorder %v186_v47, 0.5  ;;  %v748_v47 = vlaneseq }
  0xc1   :  { %2341 = vmatmul.mubr.msk.f32.vlgmr.msra.gmra.mrb[0].mxu1 %vm233_vm8, %v331_v58  ;;  %v189_v54 = vld [vmem:[%s3695_s5 + $0x12] sm:$0x1]  ;;  %vm423_vm11 = vcmp.gt.f32.partialorder %v185_v49, 0.5  ;;  %vm426_vm12 = vcmp.gt.f32.partialorder %v188_v50, 0.5  ;;  %v2226_v49 = vld [vmem:[#allocation14] ss:$0 sm:$0xff] }
  0xc2   :  { %2474 = vmatpush3.bf16.msra.mxu1 %v2471_v15  ;;  %2362 = vmatprep.mubr.msk.f32.mxu1 %vm233_vm8, %v497_v30  ;;  %vm427_vm13 = vcmp.gt.f32.partialorder %v189_v54, 0.5 }
  0xc3   :  { %2476 = vmatprep.subr.bf16.mxu1 %v2475_v24  ;;  %2470 = vmatpush3.bf16.msra.mxu0 %v2469_v29 }
  0xc4   :  { %2379 = vmatprep.subr.mxu0 %v2878_v2 }
  0xc6   :  { %2478 = vmatpush3.bf16.msra.mxu1 %v2475_v24 }
  0xc7   :  { %2374 = vmatprep.subr.mxu1 %v2878_v2 }
  0xc9   :  { %2363 = vmatmul.mubr.msk.f32.vlgmr.msra.gmra.mrb[2].mxu1 %vm233_vm8, %v3203_v31 }
  0xca   :  { %2365 = vmatprep.mubr.msk.f32.mxu1 %vm233_vm8, %v3213_v33  ;;  %2375 = vmatpush3.msra.mxu1 %v497_v30 }
  0xcb   :  { %2394 = vmatprep.subr.mxu1 %v2878_v2 }
  0xcd   :  { %2366 = vmatmul.mubr.msk.f32.gmra.mrb[4].mxu1 %vm233_vm8, %v3222_v35 }
  0xce   :  { %2368 = vmatprep.mubr.msk.f32.mxu1 %vm233_vm8, %v3227_v36 }
  0xd1   :  { %2369 = vmatmul.mubr.msk.f32.gmra.mrb[6].mxu1 %vm233_vm8, %v3239_v39 }
  0xd2   :  { %2371 = vmatprep.mubr.msk.f32.mxu1 %vm233_vm8, %v3244_v40 }
  0xd5   :  { %2372 = vmatmul.mubr.msk.f32.gmra.mrb[8].mxu1 %vm233_vm8, %v3255_v42 }
  0xd6   :  { %2376 = vmatprep.mubr.msk.f32.mxu1 %vm2877_vm0, %v2878_v2 }
 0x191   :  { %v302_v60 = vpop.f32.mrb[0].mxu0 }
 0x192   :  { %v3187_v61 = vadd.f32 %v2221_v59, %v302_v60  ;;  %v2331_v62 = vpop.f32.mrb[1].mxu0  ;;  %v190_v59 = vld [vmem:[%s3695_s5 + $0x16] sm:$0x1] }
 0x193   :  { %vm428_vm14 = vcmp.gt.f32.partialorder %v190_v59, 0.5 }
 0x194   :  { %v2224_v63 = vmul.f32 -1.442695, %v3187_v61  ;;  %v400_v0 = vpop.f32.mrb[0].mxu1 }
 0x195   :  { %412 = vrot.lane.b32.xlu0 %v400_v0, %s2879_s27  ;;  %v2342_v3 = vpop.f32.mrb[1].mxu1 }
 0x196   :  { %2522 = vpow2.f32 %v2224_v63 }
 0x19c   :  { %v2364_v29 = vpop.f32.mrb[2].mxu1 }
 0x19d   :  { %v704_v30 = vpop.f32.mrb[3].mxu1 }
 0x1a0   :  { %v2523_v4 = vpop.eup %2522 }
 0x1a1   :  { %v408_v5 = vadd.f32 1.0, %v2523_v4  ;;  %v191_v4 = vld [vmem:[%s3695_s5 + $0x1a] sm:$0x1] }
 0x1a2   :  { %vm429_vm15 = vcmp.gt.f32.partialorder %v191_v4, 0.5 }
 0x1a3   :  { %2524 = vrcp.f32 %v408_v5 }
 0x1ad   :  { %v2525_v6 = vpop.eup %2524 }
 0x1ae   :  { %437 = vrot.lane.b32.xlu1 %v2525_v6, %s2880_s3 }
 0x207   :  { %v413_v7 = vpop.permute.xlu0 %412 }
 0x208   :  { %v415_v8 = vadd.f32 %v413_v7, %v3187_v61 }
 0x20a   :  { %v2225_v9 = vmul.f32 -1.442695, %v415_v8 }
 0x20c   :  { %2526 = vpow2.f32 %v2225_v9 }
 0x216   :  { %v2527_v10 = vpop.eup %2526 }
 0x217   :  { %v420_v11 = vadd.f32 1.0, %v2527_v10 }
 0x219   :  { %2528 = vrcp.f32 %v420_v11  ;;  %v192_v11 = vld [vmem:[%s3695_s5 + $0x1e] sm:$0x1] }
 0x21a   :  { %2530 = vtanh.f32 %v415_v8 }
 0x21b   :  { %2532 = vtanh.f32 %v3187_v61 }
 0x220   :  { %v438_v43 = vpop.permute.xlu1 %437 }
 0x223   :  { %v2529_v12 = vpop.eup %2528 }
 0x224   :  { %432 = vrot.lane.b32.xlu0 %v2529_v12, %s2880_s3  ;;  %v2531_v18 = vpop.eup %2530 }
 0x225   :  { %v2533_v44 = vpop.eup %2532 }
 0x226   :  { %v440_v45 = vmul.f32 %v2533_v44, %v438_v43  ;;  %v2881_v44 = vmov 0  }
 0x227   :  { %2521 = vset.pattern.permute.xlu0 %v2881_v44 }
 0x228   :  { %v475_v52 = vrot.slane %v440_v45, 2  ;;  %v474_v53 = vrot.slane %v440_v45, 1  ;;  %v476_v58 = vrot.slane %v440_v45, 3  ;;  %v477_v3 = vrot.slane %v440_v45, 4 }
 0x229   :  { %v478_v10 = vrot.slane %v440_v45, 5  ;;  %v479_v16 = vrot.slane %v440_v45, 6 }
 0x296   :  { %v433_v19 = vpop.permute.xlu0 %432 }
 0x297   :  { %v435_v21 = vmul.f32 %v2531_v18, %v433_v19 }
 0x299   :  { %449 = vrot.lane.b32.xlu1 %v435_v21, %s2879_s27  ;;  %v443_v25 = vrot.slane %v435_v21, 2  ;;  %v442_v28 = vrot.slane %v435_v21, 1  ;;  %v444_v32 = vrot.slane %v435_v21, 3  ;;  %v445_v34 = vrot.slane %v435_v21, 4 }
 0x29a   :  { %v446_v37 = vrot.slane %v435_v21, 5  ;;  %v447_v38 = vrot.slane %v435_v21, 6  ;;  %v448_v41 = vrot.slane %v435_v21, 7  ;;  %v480_v21 = vrot.slane %v440_v45, 7 }
 0x29b   :  { %453 = vrot.lane.b32.xlu0 %v443_v25, %s2879_s27 }
 0x29d   :  { %451 = vrot.lane.b32.xlu1 %v442_v28, %s2879_s27 }
 0x29f   :  { %455 = vrot.lane.b32.xlu0 %v444_v32, %s2879_s27  ;;  %v2367_v32 = vpop.f32.mrb[4].mxu1 }
 0x2a1   :  { %457 = vrot.lane.b32.xlu1 %v445_v34, %s2879_s27  ;;  %v714_v34 = vpop.f32.mrb[5].mxu1 }
 0x2a3   :  { %459 = vrot.lane.b32.xlu0 %v446_v37, %s2879_s27  ;;  %v2370_v37 = vpop.f32.mrb[6].mxu1 }
 0x2a5   :  { %461 = vrot.lane.b32.xlu1 %v447_v38, %s2879_s27  ;;  %v724_v38 = vpop.f32.mrb[7].mxu1 }
 0x2a7   :  { %463 = vrot.lane.b32.xlu0 %v448_v41, %s2879_s27  ;;  %v2373_v41 = vpop.f32.mrb[8].mxu1 }
 0x2a8   :  { %v734_v43 = vpop.f32.mrb[9].mxu1 }
 0x30b   :  { %v450_v48 = vpop.permute.xlu1 %449 }
 0x30c   :  { %v489_v62 = vsel %vm423_vm11, %v450_v48, %v440_v45  ;;  %v2882_v45 = vmov 1966171168   ;;  %vm959_vm11 = vcmask 64512  }
 0x30d   :  { %v454_v51 = vpop.permute.xlu0 %453  ;;  %v746_v46 = vunpack.c.l.s4 %v2882_v45 }
 0x30e   :  { %v491_v55 = vsel %vm425_vm9, %v454_v51, %v475_v52  ;;  %vm430_vm9 = vcmp.gt.f32.partialorder %v192_v11, 0.5 }
 0x30f   :  { %v452_v56 = vpop.permute.xlu1 %451  ;;  %v526_v63 = vrot.slane %v491_v55, 6  ;;  %v747_v48 = vunpack.c.0.s8 %v746_v46 }
 0x310   :  { %v490_v57 = vsel %vm424_vm10, %v452_v56, %v474_v53 }
 0x311   :  { %v524_v60 = vrot.slane %v490_v57, 7  ;;  %v456_v61 = vpop.permute.xlu0 %455 }
 0x312   :  { %v492_v0 = vsel %vm426_vm12, %v456_v61, %v476_v58  ;;  %vm1835_vm12 = vcmask 257024  }
 0x313   :  { %v525_v5 = vsel %vm213_vm1, %v524_v60, %v489_v62  ;;  %v528_v6 = vrot.slane %v492_v0, 5  ;;  %v458_v7 = vpop.permute.xlu1 %457 }
 0x314   :  { %v527_v8 = vsel %vm216_vm2, %v526_v63, %v525_v5  ;;  %v493_v9 = vsel %vm427_vm13, %v458_v7, %v477_v3 }
 0x315   :  { %v529_v12 = vsel %vm219_vm3, %v528_v6, %v527_v8  ;;  %v530_v13 = vrot.slane %v493_v9, 4  ;;  %v460_v14 = vpop.permute.xlu0 %459 }
 0x316   :  { %v494_v15 = vsel %vm428_vm14, %v460_v14, %v478_v10 }
 0x317   :  { %v531_v17 = vsel %vm222_vm4, %v530_v13, %v529_v12  ;;  %v532_v18 = vrot.slane %v494_v15, 3  ;;  %v462_v19 = vpop.permute.xlu1 %461 }
 0x318   :  { %v495_v20 = vsel %vm429_vm15, %v462_v19, %v479_v16 }
 0x319   :  { %v533_v22 = vsel %vm225_vm5, %v532_v18, %v531_v17  ;;  %v534_v23 = vrot.slane %v495_v20, 2  ;;  %v464_v24 = vpop.permute.xlu0 %463 }
 0x31a   :  { %v496_v25 = vsel %vm430_vm9, %v464_v24, %v480_v21 }
 0x31b   :  { %v535_v26 = vsel %vm228_vm6, %v534_v23, %v533_v22  ;;  %v536_v27 = vrot.slane %v496_v25, 1  ;;  %v2236_v22 = vld [vmem:[#allocation15] ss:$0 sm:$0xff] }
 0x31d   :  { %v3293_v28 = vsel %vm231_vm7, %v536_v27, %v535_v26 }
 0x31e   :  { %2352 = vmatmul.mubr.msk.f32.vlgmr.msra.gmra.mrb[2].mxu0 %vm233_vm8, %v3293_v28  ;;  %2158 = vst.msk [vmem:[#allocation20] sm:$0xff] %vm233_vm8, %v3293_v28 }
 0x31f   :  { %2380 = vmatpush3.msra.mxu0 %v3203_v31  ;;  %2381 = vmatprep.mubr.msk.f32.mxu0 %vm2877_vm0, %v2878_v2  ;;  %v3304_v31 = vshrl.u32 %v748_v47, 7 }
 0x320   :  { %2384 = vmatprep.subr.mxu0 %v2878_v2 }
 0x321   :  { %v3307_v50 = vsub.s32 %v747_v48, %v3304_v31  ;;  %v3311_v56 = vsub.s32 0, %v3304_v31 }
 0x3f1   :  { %v606_v51 = vpop.f32.mrb[2].mxu0 }
 0x3f2   :  { %v607_v52 = vadd.f32 %v2226_v49, %v606_v51  ;;  %v2353_v53 = vpop.f32.mrb[3].mxu0 }
 0x3f4   :  { %v744_v54 = vcombine.high %v607_v52, %v607_v52  ;;  %v751_v55 = vrot.slane %v607_v52, %v3307_v50 }
 0x3f6   :  { %v758_v57 = vrot.slane %v744_v54, %v3307_v50  ;;  %v759_v58 = vcombine.high %v751_v55, %v751_v55  ;;  %v767_v59 = vrot.slane %v751_v55, %v3307_v50 }
 0x3f8   :  { %v781_v60 = vrot.slane %v759_v58, %v3307_v50  ;;  %v796_v61 = vrot.slane %v767_v59, %v3311_v56  ;;  %v789_v62 = vcombine.high %v767_v59, %v767_v59  ;;  %v760_v63 = vcombine.high %v758_v57, %v758_v57  ;;  %v2237_v58 = vld [vmem:[#allocation2] ss:$0 sm:$0xff] }
 0x3f9   :  { %v774_v0 = vrot.slane %v758_v57, %v3307_v50 }
 0x3fa   :  { %v800_v3 = vrot.slane %v781_v60, %v3311_v56  ;;  %v833_v4 = vadd.f32 %v796_v61, %v704_v30  ;;  %v791_v5 = vcombine.high %v781_v60, %v781_v60  ;;  %v804_v6 = vrot.slane %v789_v62, %v3311_v56 }
 0x3fb   :  { %v788_v7 = vrot.slane %v760_v63, %v3307_v50  ;;  %v812_v8 = vrot.slane %v774_v0, %v3311_v56  ;;  %v790_v9 = vcombine.high %v774_v0, %v774_v0  ;;  %v3335_v0 = vand.u32 127, %v748_v47 }
 0x3fc   :  { %v834_v10 = vadd.f32 %v2364_v29, %v800_v3  ;;  %2534 = vtanh.f32 %v833_v4  ;;  %v808_v11 = vrot.slane %v791_v5, %v3311_v56  ;;  %v835_v12 = vadd.f32 %v804_v6, %v714_v34 }
 0x3fd   :  { %v816_v13 = vrot.slane %v788_v7, %v3311_v56  ;;  %v837_v14 = vadd.f32 %v812_v8, %v724_v38  ;;  %v792_v15 = vcombine.high %v788_v7, %v788_v7  ;;  %v820_v16 = vrot.slane %v790_v9, %v3311_v56 }
 0x3fe   :  { %2536 = vtanh.f32 %v834_v10  ;;  %v836_v17 = vadd.f32 %v2367_v32, %v808_v11  ;;  %v3339_v5 = vsub.s32 %v3335_v0, %v3304_v31 }
 0x3ff   :  { %2538 = vtanh.f32 %v835_v12  ;;  %v838_v18 = vadd.f32 %v2370_v37, %v816_v13  ;;  %v824_v19 = vrot.slane %v792_v15, %v3311_v56  ;;  %v839_v20 = vadd.f32 %v820_v16, %v734_v43 }
 0x400   :  { %2540 = vtanh.f32 %v836_v17 }
 0x401   :  { %2542 = vtanh.f32 %v838_v18  ;;  %v840_v21 = vadd.f32 %v2373_v41, %v824_v19 }
 0x402   :  { %2544 = vtanh.f32 %v837_v14 }
 0x403   :  { %2546 = vtanh.f32 %v840_v21 }
 0x404   :  { %2548 = vtanh.f32 %v839_v20  ;;  %v906_v20 = vld [vmem:[#allocation3] sm:$0xff] }
 0x405   :  { %vm907_vm10 = vcmp.gt.f32.partialorder %v906_v20, 0.5 }
 0x406   :  { %v2535_v23 = vpop.eup %2534 }
 0x407   :  { %v856_v24 = vmul.f32 %v2535_v23, %v2236_v22 }
 0x408   :  { %v2537_v25 = vpop.eup %2536 }
 0x409   :  { %v2539_v26 = vpop.eup %2538  ;;  %v864_v27 = vsel %vm233_vm8, %v856_v24, 0.0  ;;  %v857_v29 = vmul.f32 %v2537_v25, %v2236_v22 }
 0x40a   :  { %v2541_v30 = vpop.eup %2540  ;;  %865 = vadd.xlane.f32.xlu1 %v864_v27  ;;  %v858_v38 = vmul.f32 %v2539_v26, %v2236_v22 }
 0x40b   :  { %v2543_v32 = vpop.eup %2542  ;;  %v867_v34 = vsel %vm233_vm8, %v857_v29, 0.0  ;;  %v859_v37 = vmul.f32 %v2541_v30, %v2236_v22 }
 0x40c   :  { %v2545_v43 = vpop.eup %2544  ;;  %868 = vadd.xlane.f32.xlu0 %v867_v34  ;;  %v861_v44 = vmul.f32 %v2543_v32, %v2236_v22  ;;  %v870_v46 = vsel %vm233_vm8, %v858_v38, 0.0 }
 0x40d   :  { %v873_v41 = vsel %vm233_vm8, %v859_v37, 0.0  ;;  %v2547_v45 = vpop.eup %2546  ;;  %v860_v48 = vmul.f32 %v2545_v43, %v2236_v22 }
 0x40e   :  { %874 = vadd.xlane.f32.xlu1 %v873_v41  ;;  %v2549_v49 = vpop.eup %2548  ;;  %v879_v51 = vsel %vm233_vm8, %v861_v44, 0.0  ;;  %v863_v52 = vmul.f32 %v2547_v45, %v2236_v22 }
 0x40f   :  { %v876_v53 = vsel %vm233_vm8, %v860_v48, 0.0  ;;  %v862_v54 = vmul.f32 %v2549_v49, %v2236_v22 }
 0x410   :  { %871 = vadd.xlane.f32.xlu0 %v870_v46  ;;  %v885_v55 = vsel %vm233_vm8, %v863_v52, 0.0 }
 0x411   :  { %v882_v57 = vsel %vm233_vm8, %v862_v54, 0.0 }
 0x412   :  { %880 = vadd.xlane.f32.xlu1 %v879_v51 }
 0x414   :  { %877 = vadd.xlane.f32.xlu0 %v876_v53 }
 0x416   :  { %886 = vadd.xlane.f32.xlu1 %v885_v55 }
 0x418   :  { %883 = vadd.xlane.f32.xlu0 %v882_v57 }
 0x42e   :  { %895 = vperm.xlu0 %2521, %v2237_v58  }
 0x497   :  { %v866_v61 = vpop.xlane.xlu1 %865 }
 0x499   :  { %v869_v59 = vpop.xlane.xlu0 %868 }
 0x49b   :  { %v875_v63 = vpop.xlane.xlu1 %874 }
 0x49d   :  { %v872_v60 = vpop.xlane.xlu0 %871 }
 0x49f   :  { %v881_v4 = vpop.xlane.xlu1 %880 }
 0x4a1   :  { %v878_v62 = vpop.xlane.xlu0 %877 }
 0x4a3   :  { %v887_v15 = vpop.xlane.xlu1 %886 }
 0x4a5   :  { %v884_v3 = vpop.xlane.xlu0 %883 }
 0x4ad   :  { %v896_v6 = vpop.permute.xlu0 %895 }
 0x4ae   :  { %v898_v7 = vadd.f32 %v896_v6, %v866_v61  ;;  %v899_v8 = vadd.f32 %v896_v6, %v869_v59  ;;  %v900_v9 = vadd.f32 %v896_v6, %v872_v60  ;;  %v901_v10 = vadd.f32 %v896_v6, %v875_v63  ;;  %v1625_v61 = vld [vmem:[%s3671_s13 + $0x8] sm:$0xff] }
 0x4af   :  { %v902_v11 = vadd.f32 %v896_v6, %v878_v62  ;;  %v903_v12 = vadd.f32 %v896_v6, %v881_v4  ;;  %v904_v16 = vadd.f32 %v896_v6, %v884_v3  ;;  %v905_v17 = vadd.f32 %v896_v6, %v887_v15  ;;  %v1626_v62 = vld [vmem:[%s3671_s13 + $0x10] sm:$0xff]  ;;  %v1869_v3 = vld [vmem:[%s3673_s15 + $0x8] sm:$0xff] }
 0x4b0   :  { %v921_v13 = vrot.slane %v898_v7, %v3339_v5  ;;  %v925_v14 = vrot.slane %v899_v8, %v3339_v5  ;;  %v929_v47 = vrot.slane %v900_v9, %v3339_v5  ;;  %v933_v18 = vrot.slane %v901_v10, %v3339_v5  ;;  %v1870_v6 = vld [vmem:[%s3673_s15 + $0x10] sm:$0xff]  ;;  %v1871_v8 = vld [vmem:[%s3673_s15 + $0x18] sm:$0xff]  ;;  %v1628_v9 = vld [vmem:[%s3671_s13 + $0x20] sm:$0xff] }
 0x4b1   :  { %v937_v21 = vrot.slane %v902_v11, %v3339_v5  ;;  %v941_v23 = vrot.slane %v903_v12, %v3339_v5  ;;  %v945_v25 = vrot.slane %v904_v16, %v3339_v5  ;;  %v949_v27 = vrot.slane %v905_v17, %v3339_v5  ;;  %v1629_v10 = vld [vmem:[%s3671_s13 + $0x28] sm:$0xff]  ;;  %v1860_v12 = vld [vmem:[%s3697_s9] sm:$0xff] }
 0x4b2   :  { %v950_v19 = vsel %vm213_vm1, %v925_v14, %v921_v13  ;;  %v2495_v11 = vpack.c.bf16 %v1871_v8, %v1870_v6  ;;  %v2486_v13 = vpack.c.bf16 %v1629_v10, %v1628_v9  ;;  %v1630_v14 = vld [vmem:[%s3671_s13 + $0x30] sm:$0xff]  ;;  %v2246_v6 = vld [vmem:[%s3672_s14] ss:$0 sm:$0xff] }
 0x4b3   :  { %v951_v22 = vsel %vm216_vm2, %v929_v47, %v950_v19  ;;  %v1631_v47 = vld [vmem:[%s3671_s13 + $0x38] sm:$0xff] }
 0x4b4   :  { %v952_v24 = vsel %vm219_vm3, %v933_v18, %v951_v22  ;;  %v2489_v15 = vpack.c.bf16 %v1631_v47, %v1630_v14  ;;  %v1764_v14 = vld [vmem:[%s3675_s17] sm:$0xf] }
 0x4b5   :  { %v953_v26 = vsel %vm222_vm4, %v937_v21, %v952_v24 }
 0x4b6   :  { %v954_v29 = vsel %vm225_vm5, %v941_v23, %v953_v26 }
 0x4b7   :  { %v955_v30 = vsel %vm228_vm6, %v945_v25, %v954_v29 }
 0x4b8   :  { %v956_v32 = vsel %vm231_vm7, %v949_v27, %v955_v30 }
 0x4b9   :  { %v958_v34 = vsel %vm907_vm10, -1e+12, %v956_v32 }
 0x4ba   :  { %v960_v37 = vsel %vm959_vm11, %v958_v34, -inf }
 0x4bb   :  { %961 = vmax.xlane.f32.xlu1 %v960_v37 }
 0x548   :  { %v962_v38 = vpop.xlane.xlu1 %961 }
 0x549   :  { %v963_v43 = vsub.f32 %v958_v34, %v962_v38  ;;  %v1862_v34 = vld [vmem:[%s3697_s9 + $0x10] sm:$0xff] }
 0x54b   :  { %v964_v41 = vmul.f32 1.442695, %v963_v43  ;;  %v1863_v43 = vld [vmem:[%s3697_s9 + $0x18] sm:$0xff] }
 0x54d   :  { %2550 = vpow2.f32 %v964_v41 }
 0x557   :  { %v2551_v44 = vpop.eup %2550 }
 0x558   :  { %v966_v45 = vsel %vm959_vm11, %v2551_v44, 0.0 }
 0x559   :  { %967 = vadd.xlane.f32.xlu1 %v966_v45 }
 0x5e6   :  { %v968_v46 = vpop.xlane.xlu1 %967 }
 0x5e7   :  { %2552 = vrcp.f32 %v968_v46 }
 0x5f1   :  { %v2553_v48 = vpop.eup %2552 }
 0x5f2   :  { %v970_v49 = vmul.f32 %v2553_v48, %v2551_v44  ;;  %v1864_v44 = vld [vmem:[%s3697_s9 + $0x20] sm:$0xff] }
 0x5f4   :  { %v972_v51 = vcombine.high %v970_v49, %v970_v49  ;;  %v979_v52 = vrot.slane %v970_v49, %v3307_v50 }
 0x5f6   :  { %v995_v53 = vrot.slane %v979_v52, %v3307_v50  ;;  %v987_v54 = vcombine.high %v979_v52, %v979_v52  ;;  %v986_v55 = vrot.slane %v972_v51, %v3307_v50  ;;  %v1865_v52 = vld [vmem:[%s3697_s9 + $0x28] sm:$0xff] }
 0x5f8   :  { %2377 = vmatmul.mubr.msk.f32.vlgmr.msra.gmra.mrb[10].mxu1 %vm959_vm11, %v995_v53  ;;  %v1009_v57 = vrot.slane %v987_v54, %v3307_v50  ;;  %v1002_v58 = vrot.slane %v986_v55, %v3307_v50  ;;  %v1017_v59 = vcombine.high %v995_v53, %v995_v53  ;;  %v988_v60 = vcombine.high %v986_v55, %v986_v55  ;;  %v1866_v54 = vld [vmem:[%s3697_s9 + $0x30] sm:$0xff] }
 0x5f9   :  { %2395 = vmatpush3.msra.mxu1 %v3227_v36  ;;  %2396 = vmatprep.mubr.msk.f32.mxu1 %vm2877_vm0, %v2878_v2 }
 0x5fa   :  { %2382 = vmatmul.mubr.msk.f32.vlgmr.msra.gmra.mrb[4].mxu0 %vm959_vm11, %v1009_v57  ;;  %2404 = vmatprep.subr.mxu1 %v2878_v2  ;;  %v1018_v36 = vcombine.high %v1002_v58, %v1002_v58 }
 0x5fb   :  { %2385 = vmatpush3.msra.mxu0 %v3213_v33  ;;  %2386 = vmatprep.mubr.msk.f32.mxu0 %vm2877_vm0, %v2878_v2  ;;  %v1019_v33 = vcombine.high %v1009_v57, %v1009_v57 }
 0x5fc   :  { %2397 = vmatmul.mubr.msk.f32.vlgmr.msra.gmra.mrb[12].mxu1 %vm959_vm11, %v1002_v58  ;;  %2389 = vmatprep.subr.mxu0 %v2878_v2 }
 0x5fd   :  { %2405 = vmatpush3.msra.mxu1 %v3244_v40  ;;  %2406 = vmatprep.mubr.msk.f32.mxu1 %vm2877_vm0, %v2878_v2 }
 0x5fe   :  { %2387 = vmatmul.mubr.msk.f32.vlgmr.msra.gmra.mrb[6].mxu0 %vm959_vm11, %v1017_v59  ;;  %2479 = vmatprep.subr.bf16.mxu1 %v2876_v1 }
 0x5ff   :  { %2390 = vmatpush3.msra.mxu0 %v3222_v35  ;;  %2391 = vmatprep.mubr.msk.f32.mxu0 %vm2877_vm0, %v2878_v2  ;;  %v1016_v35 = vrot.slane %v988_v60, %v3307_v50 }
 0x600   :  { %2407 = vmatmul.mubr.msk.f32.vlgmr.msra.gmra.mrb[14].mxu1 %vm959_vm11, %v1018_v36  ;;  %2399 = vmatprep.subr.mxu0 %v2878_v2 }
 0x601   :  { %2430 = vmatprep.mubr.msk.f32.mxu1 %vm2877_vm0, %v2878_v2  ;;  %v1020_v40 = vcombine.high %v1016_v35, %v1016_v35 }
 0x602   :  { %2392 = vmatmul.mubr.msk.f32.vlgmr.msra.gmra.mrb[8].mxu0 %vm959_vm11, %v1019_v33  ;;  %v1867_v33 = vld [vmem:[%s3697_s9 + $0x38] sm:$0xff] }
 0x603   :  { %2400 = vmatpush3.msra.mxu0 %v3239_v39  ;;  %2401 = vmatprep.mubr.msk.f32.mxu0 %vm2877_vm0, %v2878_v2  ;;  %v1624_v39 = vld [vmem:[%s3671_s13] sm:$0xff] }
 0x604   :  { %2409 = vmatprep.subr.mxu0 %v2878_v2  ;;  %v2480_v63 = vpack.c.bf16 %v1625_v61, %v1624_v39 }
 0x606   :  { %2402 = vmatmul.mubr.msk.f32.vlgmr.msra.gmra.mrb[10].mxu0 %vm959_vm11, %v1016_v35  ;;  %2481 = vmatpush3.bf16.msra.mxu1 %v2480_v63 }
 0x607   :  { %2410 = vmatpush3.msra.mxu0 %v3255_v42  ;;  %2411 = vmatprep.mubr.msk.f32.mxu0 %vm2877_vm0, %v2878_v2  ;;  %v1627_v2 = vld [vmem:[%s3671_s13 + $0x18] sm:$0xff]  ;;  %v1868_v42 = vld [vmem:[%s3673_s15] sm:$0xff]  ;;  %vm1639_vm0 = vcmask 523264  }
 0x608   :  { %v2491_v4 = vpack.c.bf16 %v1869_v3, %v1868_v42  ;;  %v2483_v7 = vpack.c.bf16 %v1627_v2, %v1626_v62  ;;  %2482 = vmatprep.subr.bf16.mxu1 %v2876_v1 }
 0x60a   :  { %2412 = vmatmul.mubr.msk.f32.vlgmr.msra.gmra.mrb[12].mxu0 %vm959_vm11, %v1020_v40  ;;  %2492 = vmatprep.subr.bf16.mxu0 %v2491_v4 }
 0x60b   :  { %2494 = vmatpush3.bf16.msra.mxu0 %v2491_v4  ;;  %2441 = vmatprep.mubr.msk.f32.mxu0 %vm233_vm8, %v1860_v12 }
 0x60c   :  { %2496 = vmatprep.subr.bf16.mxu0 %v2495_v11  ;;  %2484 = vmatpush3.bf16.msra.mxu1 %v2483_v7 }
 0x60d   :  { %2485 = vmatprep.subr.bf16.mxu1 %v2876_v1 }
 0x60f   :  { %2498 = vmatpush3.bf16.msra.mxu0 %v2495_v11 }
 0x610   :  { %2487 = vmatpush3.bf16.msra.mxu1 %v2486_v13 }
 0x611   :  { %2488 = vmatprep.subr.bf16.mxu1 %v2876_v1  ;;  %v1861_v1 = vld [vmem:[%s3697_s9 + $0x8] sm:$0xff] }
 0x612   :  { %2442 = vmatmul.mubr.msk.f32.vlgmr.msra.gmra.mrb[14].mxu0 %vm233_vm8, %v1861_v1 }
 0x613   :  { %2444 = vmatprep.mubr.msk.f32.mxu0 %vm233_vm8, %v1862_v34 }
 0x614   :  { %2490 = vmatpush3.bf16.msra.mxu1 %v2489_v15 }
 0x616   :  { %2445 = vmatmul.mubr.msk.f32.gmra.mrb[16].mxu0 %vm233_vm8, %v1863_v43  ;;  %v3512_v43 = vld [vmem:[%s3674_s16] ss:$0 sm:$0xff]  ;;  %s2884_s16 = smov [#allocation21]  }
 0x617   :  { %2447 = vmatprep.mubr.msk.f32.mxu0 %vm233_vm8, %v1864_v44  ;;  %s2197_s15 = sshll.u32 %s2884_s16, 4  ;;  %s2198_s15 = int_to_ptr.vmem [resolvable:$true] %s2197_s15 }
 0x618   :  { %s2762_s0 = scalar_lea.vmem %s2198_s15, 128  ;;  %p2767_p9 = scmp.lt.s32.totalorder %s2198_s15, %s2198_s15 }
 0x619   :  { %p2763_p8 = scmp.ne.s32.totalorder %s2198_s15, %s2762_s0  ;;  %p2768_p10 = scmp.lt.s32.totalorder %s2762_s0, %s2762_s0 }
 0x61a   :  { %2448 = vmatmul.mubr.msk.f32.gmra.mrb[18].mxu0 %vm233_vm8, %v1865_v52 }
 0x61b   :  { %2450 = vmatprep.mubr.msk.f32.mxu0 %vm233_vm8, %v1866_v54  ;;  %p2769_p11 = por %p2768_p10, %p2767_p9 }
 0x61d   :  { %p2770_p12 = pnand %p2769_p11, %p2763_p8 }
 0x61e   :  { %2451 = vmatmul.mubr.msk.f32.gmra.mrb[20].mxu0 %vm233_vm8, %v1867_v33 }
 0x6cb   :  { %v1089_v16 = vpop.f32.mrb[10].mxu1 }
 0x6cc   :  { %v2378_v17 = vpop.f32.mrb[11].mxu1 }
 0x6cd   :  { %v1161_v18 = vpop.f32.mrb[4].mxu0 }
 0x6ce   :  { %v1606_v19 = vrot.slane %v1161_v18, 7  ;;  %v2383_v20 = vpop.f32.mrb[5].mxu0 }
 0x6cf   :  { %v1377_v21 = vpop.f32.mrb[12].mxu1 }
 0x6d0   :  { %v1607_v22 = vsel %vm213_vm1, %v1606_v19, %v1089_v16  ;;  %v2398_v23 = vpop.f32.mrb[13].mxu1  ;;  %v1612_v41 = vrot.slane %v1377_v21, 4 }
 0x6d1   :  { %v1233_v24 = vpop.f32.mrb[6].mxu0 }
 0x6d2   :  { %v1608_v25 = vrot.slane %v1233_v24, 6  ;;  %v2388_v26 = vpop.f32.mrb[7].mxu0 }
 0x6d3   :  { %v1521_v27 = vpop.f32.mrb[14].mxu1 }
 0x6d4   :  { %v1609_v29 = vsel %vm216_vm2, %v1608_v25, %v1607_v22  ;;  %v2408_v30 = vpop.f32.mrb[15].mxu1  ;;  %v1616_v53 = vrot.slane %v1521_v27, 2 }
 0x6d5   :  { %v1305_v32 = vpop.f32.mrb[8].mxu0 }
 0x6d6   :  { %v1610_v37 = vrot.slane %v1305_v32, 5  ;;  %v2393_v38 = vpop.f32.mrb[9].mxu0 }
 0x6d8   :  { %v1611_v45 = vsel %vm219_vm3, %v1610_v37, %v1609_v29 }
 0x6d9   :  { %v1449_v46 = vpop.f32.mrb[10].mxu0  ;;  %v1613_v48 = vsel %vm222_vm4, %v1612_v41, %v1611_v45 }
 0x6da   :  { %v1614_v49 = vrot.slane %v1449_v46, 3  ;;  %v2403_v51 = vpop.f32.mrb[11].mxu0 }
 0x6dc   :  { %v1615_v55 = vsel %vm225_vm5, %v1614_v49, %v1613_v48 }
 0x6dd   :  { %v1593_v57 = vpop.f32.mrb[12].mxu0  ;;  %v1617_v58 = vsel %vm228_vm6, %v1616_v53, %v1615_v55 }
 0x6de   :  { %v1618_v59 = vrot.slane %v1593_v57, 1  ;;  %v2413_v36 = vpop.f32.mrb[13].mxu0 }
 0x6e0   :  { %v1619_v60 = vsel %vm231_vm7, %v1618_v59, %v1617_v58 }
 0x6e1   :  { %1620 = vrot.lane.b32.xlu1 %v1619_v60, %s2883_s8  ;;  %2160 = vst.msk [vmem:[#allocation21] sm:$0xff] %vm233_vm8, %v1619_v60 }
 0x6e5   :  { %v2443_v39 = vpop.f32.mrb[14].mxu0 }
 0x6e6   :  { %v1962_v61 = vpop.f32.mrb[15].mxu0 }
 0x6e9   :  { %v3478_v62 = vpop.f32.mrb[16].mxu0 }
 0x6ea   :  { %v1972_v63 = vpop.f32.mrb[17].mxu0 }
 0x6ed   :  { %v3480_v2 = vpop.f32.mrb[18].mxu0 }
 0x6ee   :  { %v1982_v42 = vpop.f32.mrb[19].mxu0 }
 0x6f1   :  { %v3482_v3 = vpop.f32.mrb[20].mxu0 }
 0x6f2   :  { %v3484_v4 = vpop.f32.mrb[21].mxu0 }
 0x753   :  { %v1621_v35 = vpop.permute.xlu1 %1620 }
 0x754   :  { %v1623_v40 = vsel %vm233_vm8, %v3293_v28, %v1621_v35 }
 0x755   :  { %2431 = vmatmul.mubr.msk.f32.vlgmr.msra.gmra.mrb[16].mxu1 %vm1639_vm0, %v1623_v40 }
 0x828   :  { %v1709_v7 = vpop.f32.mrb[16].mxu1 }
 0x829   :  { %v3489_v8 = vadd.f32 %v2246_v6, %v1709_v7  ;;  %v2432_v28 = vpop.f32.mrb[17].mxu1 }
 0x82b   :  { %v1714_v9 = vcombine.high %v3489_v8, %v3489_v8  ;;  %v1721_v10 = vrot.slane %v3489_v8, %v3307_v50 }
 0x82d   :  { %v1728_v11 = vrot.slane %v1714_v9, %v3307_v50  ;;  %v1729_v12 = vcombine.high %v1721_v10, %v1721_v10  ;;  %v1737_v13 = vrot.slane %v1721_v10, %v3307_v50 }
 0x82f   :  { %v1751_v47 = vrot.slane %v1729_v12, %v3307_v50  ;;  %v1768_v15 = vrot.slane %v1737_v13, %v3311_v56  ;;  %v1759_v16 = vcombine.high %v1737_v13, %v1737_v13  ;;  %v1730_v17 = vcombine.high %v1728_v11, %v1728_v11 }
 0x830   :  { %v1744_v18 = vrot.slane %v1728_v11, %v3307_v50 }
 0x831   :  { %v1772_v19 = vrot.slane %v1751_v47, %v3311_v56  ;;  %v1805_v20 = vadd.f32 %v1768_v15, %v1764_v14  ;;  %v2001_v21 = vadd.f32 %v1962_v61, %v1768_v15  ;;  %v1761_v22 = vcombine.high %v1751_v47, %v1751_v47 }
 0x832   :  { %v1776_v25 = vrot.slane %v1759_v16, %v3311_v56  ;;  %v1758_v27 = vrot.slane %v1730_v17, %v3307_v50  ;;  %v1784_v29 = vrot.slane %v1744_v18, %v3311_v56  ;;  %v1760_v37 = vcombine.high %v1744_v18, %v1744_v18 }
 0x833   :  { %v1806_v23 = vadd.f32 %v1772_v19, %v1764_v14  ;;  %v2002_v24 = vadd.f32 %v2443_v39, %v1772_v19  ;;  %2554 = vtanh.f32 %v1805_v20  ;;  %v1780_v26 = vrot.slane %v1761_v22, %v3311_v56 }
 0x834   :  { %2556 = vtanh.f32 %v2001_v21  ;;  %v1807_v30 = vadd.f32 %v1776_v25, %v1764_v14  ;;  %v1788_v32 = vrot.slane %v1758_v27, %v3311_v56  ;;  %v1809_v34 = vadd.f32 %v1784_v29, %v1764_v14 }
 0x835   :  { %2558 = vtanh.f32 %v1806_v23  ;;  %v1808_v1 = vadd.f32 %v1780_v26, %v1764_v14  ;;  %v2003_v38 = vadd.f32 %v1972_v63, %v1776_v25  ;;  %v1762_v44 = vcombine.high %v1758_v27, %v1758_v27 }
 0x836   :  { %2560 = vtanh.f32 %v2002_v24  ;;  %v1810_v50 = vadd.f32 %v1788_v32, %v1764_v14  ;;  %v1792_v45 = vrot.slane %v1760_v37, %v3311_v56  ;;  %v2005_v51 = vadd.f32 %v1982_v42, %v1784_v29 }
 0x837   :  { %2562 = vtanh.f32 %v1807_v30  ;;  %v1796_v57 = vrot.slane %v1762_v44, %v3311_v56  ;;  %v2004_v36 = vadd.f32 %v3478_v62, %v1780_v26  ;;  %v2006_v56 = vadd.f32 %v3480_v2, %v1788_v32 }
 0x838   :  { %2564 = vtanh.f32 %v1808_v1  ;;  %v1811_v58 = vadd.f32 %v1792_v45, %v1764_v14  ;;  %v2007_v10 = vadd.f32 %v3484_v4, %v1792_v45 }
 0x839   :  { %2566 = vtanh.f32 %v1809_v34  ;;  %v1812_v40 = vadd.f32 %v1796_v57, %v1764_v14  ;;  %v2008_v15 = vadd.f32 %v3482_v3, %v1796_v57 }
 0x83a   :  { %2568 = vtanh.f32 %v2003_v38 }
 0x83b   :  { %2570 = vtanh.f32 %v1810_v50 }
 0x83c   :  { %2572 = vtanh.f32 %v2005_v51 }
 0x83d   :  { %v2555_v41 = vpop.eup %2554  ;;  %2574 = vtanh.f32 %v1811_v58 }
 0x83e   :  { %v2557_v46 = vpop.eup %2556  ;;  %v1827_v48 = vmul.f32 %v2555_v41, %v3512_v43  ;;  %2576 = vtanh.f32 %v2004_v36 }
 0x83f   :  { %v2559_v49 = vpop.eup %2558  ;;  %v2017_v54 = vmul.f32 %v2557_v46, %v3512_v43  ;;  %2578 = vtanh.f32 %v1812_v40 }
 0x840   :  { %v1836_v52 = vsel %vm1835_vm12, %v1827_v48, 0.0  ;;  %v1828_v53 = vmul.f32 %v2559_v49, %v3512_v43  ;;  %v2561_v55 = vpop.eup %2560  ;;  %2580 = vtanh.f32 %v2006_v56 }
 0x841   :  { %1837 = vadd.xlane.f32.xlu1 %v1836_v52  ;;  %v2025_v33 = vsel %vm233_vm8, %v2017_v54, 0.0  ;;  %v2018_v60 = vmul.f32 %v2561_v55, %v3512_v43  ;;  %v2563_v35 = vpop.eup %2562  ;;  %2582 = vtanh.f32 %v2007_v10 }
 0x842   :  { %v1839_v59 = vsel %vm1835_vm12, %v1828_v53, 0.0  ;;  %v2565_v39 = vpop.eup %2564  ;;  %v1829_v62 = vmul.f32 %v2563_v35, %v3512_v43  ;;  %2584 = vtanh.f32 %v2008_v15 }
 0x843   :  { %1840 = vadd.xlane.f32.xlu0 %v1839_v59  ;;  %v2567_v61 = vpop.eup %2566  ;;  %v2028_v42 = vsel %vm233_vm8, %v2018_v60, 0.0  ;;  %v1830_v28 = vmul.f32 %v2565_v39, %v3512_v43 }
 0x844   :  { %v1831_v63 = vmul.f32 %v2567_v61, %v3512_v43  ;;  %v2569_v6 = vpop.eup %2568  ;;  %v1842_v2 = vsel %vm1835_vm12, %v1829_v62, 0.0 }
 0x845   :  { %2026 = vadd.xlane.f32.xlu1 %v2025_v33  ;;  %v2571_v9 = vpop.eup %2570  ;;  %v2019_v11 = vmul.f32 %v2569_v6, %v3512_v43  ;;  %v1845_v13 = vsel %vm1835_vm12, %v1830_v28, 0.0 }
 0x846   :  { %v1848_v7 = vsel %vm1835_vm12, %v1831_v63, 0.0  ;;  %v2573_v12 = vpop.eup %2572  ;;  %v1832_v14 = vmul.f32 %v2571_v9, %v3512_v43 }
 0x847   :  { %1849 = vadd.xlane.f32.xlu0 %v1848_v7  ;;  %v2575_v47 = vpop.eup %2574  ;;  %v2031_v16 = vsel %vm233_vm8, %v2019_v11, 0.0  ;;  %v2021_v4 = vmul.f32 %v2573_v12, %v3512_v43 }
 0x848   :  { %v2577_v17 = vpop.eup %2576  ;;  %v1851_v18 = vsel %vm1835_vm12, %v1832_v14, 0.0  ;;  %v1833_v19 = vmul.f32 %v2575_v47, %v3512_v43 }
 0x849   :  { %2029 = vadd.xlane.f32.xlu1 %v2028_v42  ;;  %v2579_v20 = vpop.eup %2578  ;;  %v2037_v21 = vsel %vm233_vm8, %v2021_v4, 0.0  ;;  %v2020_v22 = vmul.f32 %v2577_v17, %v3512_v43 }
 0x84a   :  { %v2581_v3 = vpop.eup %2580  ;;  %v1854_v23 = vsel %vm1835_vm12, %v1833_v19, 0.0  ;;  %v1834_v24 = vmul.f32 %v2579_v20, %v3512_v43 }
 0x84b   :  { %1846 = vadd.xlane.f32.xlu0 %v1845_v13  ;;  %v2034_v25 = vsel %vm233_vm8, %v2020_v22, 0.0  ;;  %v2022_v26 = vmul.f32 %v2581_v3, %v3512_v43  ;;  %v2583_v27 = vpop.eup %2582 }
 0x84c   :  { %v1857_v29 = vsel %vm1835_vm12, %v1834_v24, 0.0  ;;  %v2023_v1 = vmul.f32 %v2583_v27, %v3512_v43  ;;  %v2585_v32 = vpop.eup %2584 }
 0x84d   :  { %1843 = vadd.xlane.f32.xlu1 %v1842_v2  ;;  %v2040_v30 = vsel %vm233_vm8, %v2022_v26, 0.0  ;;  %v2024_v37 = vmul.f32 %v2585_v32, %v3512_v43 }
 0x84e   :  { %v2043_v34 = vsel %vm233_vm8, %v2023_v1, 0.0 }
 0x84f   :  { %1852 = vadd.xlane.f32.xlu0 %v1851_v18  ;;  %v2046_v38 = vsel %vm233_vm8, %v2024_v37, 0.0 }
 0x851   :  { %2032 = vadd.xlane.f32.xlu1 %v2031_v16 }
 0x853   :  { %1855 = vadd.xlane.f32.xlu0 %v1854_v23 }
 0x855   :  { %2038 = vadd.xlane.f32.xlu1 %v2037_v21 }
 0x857   :  { %1858 = vadd.xlane.f32.xlu0 %v1857_v29 }
 0x859   :  { %2035 = vadd.xlane.f32.xlu1 %v2034_v25 }
 0x85d   :  { %2041 = vadd.xlane.f32.xlu1 %v2040_v30 }
 0x861   :  { %2044 = vadd.xlane.f32.xlu1 %v2043_v34 }
 0x865   :  { %2047 = vadd.xlane.f32.xlu1 %v2046_v38 }
 0x86d   :  { %2153 = vrot.lane.b32.xlu0 %v3489_v8, %s2880_s3 }
 0x86e   :  { %2773 = shalt.err (!%p2770_p12)
}
 0x86f   :  { %s2774_s13 = scalar_lea.hbm %s3679_s21, 128 }
 0x870   :  { %p2775_p13 = scmp.ne.s32.totalorder %s3679_s21, %s2774_s13  ;;  %p2778_p0 = scmp.lt.u32.totalorder %s2774_s13, %s3679_s21 }
 0x872   :  { %p2780_p1 = pnand %p2778_p0, %p2775_p13 }
 0x874   :  { %2783 = shalt.err (!%p2780_p1)
}
 0x875   :  { %2200 = dma.vmem_to_hbm [thread:$0]  %s2198_s15, 128, %s3679_s21, [#allocation22]   ;;  %v2105_v52 = vadd.s32 4294967292, %v3335_v0  ;;  %vm2156_vm8 = vcmask 39936  }
 0x876   :  { %s2885_s21 = smov [#allocation18]   ;;  %s2886_s7 = smov [#allocation20]  }
 0x877   :  { %v3579_v59 = vsub.s32 %v2105_v52, %v3304_v31  ;;  %s2177_s10 = sshll.u32 %s2885_s21, 4  ;;  %s2187_s26 = sshll.u32 %s2886_s7, 4  ;;  %s2178_s10 = int_to_ptr.vmem [resolvable:$true] %s2177_s10  ;;  %s3590_s26 = int_to_ptr.vmem [resolvable:$true] %s2187_s26 }
 0x878   :  { %s2784_s11 = scalar_lea.vmem %s2178_s10, 128  ;;  %p2789_p3 = scmp.lt.s32.totalorder %s2178_s10, %s2178_s10 }
 0x879   :  { %p2785_p2 = scmp.ne.s32.totalorder %s2178_s10, %s2784_s11  ;;  %p2790_p4 = scmp.lt.s32.totalorder %s2784_s11, %s2784_s11 }
 0x87b   :  { %p2791_p5 = por %p2790_p4, %p2789_p3 }
 0x87d   :  { %p2792_p6 = pnand %p2791_p5, %p2785_p2 }
 0x8ce   :  { %v1838_v8 = vpop.xlane.xlu1 %1837 }
 0x8cf   :  { %v2060_v58 = vrot.slane %v1838_v8, %v3339_v5 }
 0x8d0   :  { %v1841_v43 = vpop.xlane.xlu0 %1840 }
 0x8d1   :  { %v2064_v54 = vrot.slane %v1841_v43, %v3339_v5 }
 0x8d2   :  { %v2027_v41 = vpop.xlane.xlu1 %2026 }
 0x8d3   :  { %v2089_v33 = vsel %vm213_vm1, %v2064_v54, %v2060_v58  ;;  %v2109_v39 = vrot.slane %v2027_v41, %v3579_v59 }
 0x8d4   :  { %v3566_v44 = vpop.xlane.xlu0 %1849 }
 0x8d5   :  { %v2076_v62 = vrot.slane %v3566_v44, %v3339_v5 }
 0x8d6   :  { %v2030_v50 = vpop.xlane.xlu1 %2029 }
 0x8d7   :  { %v2113_v0 = vrot.slane %v2030_v50, %v3579_v59 }
 0x8d8   :  { %v1847_v46 = vpop.xlane.xlu0 %1846 }
 0x8d9   :  { %v2072_v31 = vrot.slane %v1847_v46, %v3339_v5  ;;  %v2138_v63 = vsel %vm213_vm1, %v2113_v0, %v2109_v39 }
 0x8da   :  { %v1844_v45 = vpop.xlane.xlu1 %1843 }
 0x8db   :  { %v2068_v55 = vrot.slane %v1844_v45, %v3339_v5 }
 0x8dc   :  { %v3568_v49 = vpop.xlane.xlu0 %1852 }
 0x8dd   :  { %v2090_v60 = vsel %vm216_vm2, %v2068_v55, %v2089_v33 }
 0x8de   :  { %v2033_v48 = vpop.xlane.xlu1 %2032  ;;  %v2091_v42 = vsel %vm219_vm3, %v2072_v31, %v2090_v60 }
 0x8df   :  { %v2117_v35 = vrot.slane %v2033_v48, %v3579_v59 }
 0x8e0   :  { %v3573_v53 = vpop.xlane.xlu0 %1855 }
 0x8e1   :  { %v2139_v6 = vsel %vm216_vm2, %v2117_v35, %v2138_v63 }
 0x8e2   :  { %v3570_v51 = vpop.xlane.xlu1 %2038 }
 0x8e4   :  { %v3581_v36 = vpop.xlane.xlu0 %1858 }
 0x8e6   :  { %v2036_v57 = vpop.xlane.xlu1 %2035 }
 0x8e7   :  { %v2121_v61 = vrot.slane %v2036_v57, %v3579_v59 }
 0x8e8   :  { %v2154_v56 = vpop.permute.xlu0 %2153 }
 0x8e9   :  { %2157 = vst.msk [vmem:[#allocation18] sm:$0xff] %vm2156_vm8, %v2154_v56 }
 0x8ea   :  { %v2042_v40 = vpop.xlane.xlu1 %2041 }
 0x8ee   :  { %v2045_v7 = vpop.xlane.xlu1 %2044 }
 0x8ef   :  { %2795 = shalt.err (!%p2792_p6)
}
 0x8f0   :  { %s2796_s25 = scalar_lea.hbm %s3677_s19, 128 }
 0x8f1   :  { %p2797_p7 = scmp.ne.s32.totalorder %s3677_s19, %s2796_s25  ;;  %p2800_p8 = scmp.lt.u32.totalorder %s2796_s25, %s3677_s19 }
 0x8f3   :  { %p2802_p9 = pnand %p2800_p8, %p2797_p7 }
 0x8f5   :  { %2805 = shalt.err (!%p2802_p9)
}
 0x8f6   :  { %2180 = dma.vmem_to_hbm [thread:$0]  %s2178_s10, 128, %s3677_s19, [#allocation19]   ;;  %v2080_v28 = vrot.slane %v3568_v49, %v3339_v5  ;;  %v2140_v9 = vsel %vm219_vm3, %v2121_v61, %v2139_v6  ;;  %v2129_v10 = vrot.slane %v2042_v40, %v3579_v59 }
 0x8f7   :  { %s2806_s14 = scalar_lea.vmem %s3590_s26, 128  ;;  %p2811_p11 = scmp.lt.s32.totalorder %s3590_s26, %s3590_s26 }
 0x8f8   :  { %p2807_p10 = scmp.ne.s32.totalorder %s3590_s26, %s2806_s14  ;;  %p2812_p12 = scmp.lt.s32.totalorder %s2806_s14, %s2806_s14 }
 0x8fa   :  { %p2813_p13 = por %p2812_p12, %p2811_p11 }
 0x8fc   :  { %p2814_p0 = pnand %p2813_p13, %p2807_p10 }
 0x8fe   :  { %2817 = shalt.err (!%p2814_p0)
}
 0x8ff   :  { %s2818_s15 = scalar_lea.hbm %s3678_s20, 128 }
 0x900   :  { %p2819_p1 = scmp.ne.s32.totalorder %s3678_s20, %s2818_s15  ;;  %p2822_p2 = scmp.lt.u32.totalorder %s2818_s15, %s3678_s20 }
 0x902   :  { %p2824_p3 = pnand %p2822_p2, %p2819_p1 }
 0x904   :  { %2827 = shalt.err (!%p2824_p3)
}
 0x905   :  { %2190 = dma.vmem_to_hbm [thread:$0]  %s3590_s26, 128, %s3678_s20, [#allocation19]   ;;  %v2092_v2 = vsel %vm222_vm4, %v2076_v62, %v2091_v42  ;;  %v2084_v11 = vrot.slane %v3573_v53, %v3339_v5  ;;  %v2125_v12 = vrot.slane %v3570_v51, %v3579_v59  ;;  %v2133_v13 = vrot.slane %v2045_v7, %v3579_v59  ;;  %v2148_v47 = vld [vmem:[#allocation6] sm:$0xff]  ;;  %v2048_v16 = vpop.xlane.xlu1 %2047 }
 0x906   :  { %v2088_v14 = vrot.slane %v3581_v36, %v3339_v5  ;;  %v2093_v4 = vsel %vm225_vm5, %v2080_v28, %v2092_v2  ;;  %v2137_v18 = vrot.slane %v2048_v16, %v3579_v59  ;;  %vm2146_vm1 = vcmask 31744   ;;  %s2887_s20 = smov [#allocation17]  }
 0x907   :  { %v2141_v15 = vsel %vm222_vm4, %v2125_v12, %v2140_v9  ;;  %s2167_s30 = sshll.u32 %s2887_s20, 4  ;;  %v2094_v19 = vsel %vm228_vm6, %v2084_v11, %v2093_v4  ;;  %vm2149_vm2 = vcmp.gt.f32.partialorder %v2148_v47, 0.5  ;;  %vm2151_vm3 = vcmask 97280   ;;  %s2168_s30 = int_to_ptr.vmem [resolvable:$true] %s2167_s30 }
 0x908   :  { %v2142_v17 = vsel %vm225_vm5, %v2129_v10, %v2141_v15  ;;  %v2095_v5 = vsel %vm231_vm7, %v2088_v14, %v2094_v19  ;;  %s2828_s27 = scalar_lea.vmem %s2168_s30, 128  ;;  %p2833_p5 = scmp.lt.s32.totalorder %s2168_s30, %s2168_s30 }
 0x909   :  { %v2143_v20 = vsel %vm228_vm6, %v2133_v13, %v2142_v17  ;;  %p2829_p4 = scmp.ne.s32.totalorder %s2168_s30, %s2828_s27  ;;  %p2834_p6 = scmp.lt.s32.totalorder %s2828_s27, %s2828_s27 }
 0x90a   :  { %v2144_v21 = vsel %vm231_vm7, %v2137_v18, %v2143_v20 }
 0x90b   :  { %v2147_v22 = vsel %vm2146_vm1, %v2095_v5, %v2144_v21  ;;  %p2835_p7 = por %p2834_p6, %p2833_p5 }
 0x90c   :  { %v2150_v3 = vsel %vm2149_vm2, -1e+12, %v2147_v22 }
 0x90d   :  { %2152 = vst.msk [vmem:[#allocation17] sm:$0xff] %vm2151_vm3, %v2150_v3  ;;  %p2836_p8 = pnand %p2835_p7, %p2829_p4 }
 0x90f   :  { %2839 = shalt.err (!%p2836_p8)
}
 0x910   :  { %s2840_s12 = scalar_lea.hbm %s3676_s18, 128 }
 0x911   :  { %p2841_p9 = scmp.ne.s32.totalorder %s3676_s18, %s2840_s12  ;;  %p2844_p10 = scmp.lt.u32.totalorder %s2840_s12, %s3676_s18 }
 0x913   :  { %p2846_p11 = pnand %p2844_p10, %p2841_p9 }
 0x915   :  { %2849 = shalt.err (!%p2846_p11)
}
 0x916   :  { %2170 = dma.vmem_to_hbm [thread:$0]  %s2168_s30, 128, %s3676_s18, [#allocation5]  }
 0x917   :  { %2860 = dma.done.wait [#allocation5], 128  }
 0x918   :  { %2861 = vsyncadd [#allocation5], 4294967168 }
 0x919   :  { %2862 = dma.done.wait [#allocation19], 256  }
 0x91a   :  { %2863 = vsyncadd [#allocation19], 4294967040 }
 0x91b   :  { %2864 = dma.done.wait [#allocation22], 128  }
 0x91c   :  { %2865 = vsyncadd [#allocation22], 4294967168 }
 0x91d   :  { %2213 = vsyncpa [#allocation4], 1 }
 0x91e   :  { %2214 = vsyncpa [#allocation7], 1 }
 0x91f   :  { %2215 = vsyncpa [#allocation10], 1 }
 0x920   :  { %2216 = vsyncpa [#allocation13], 1 }
 0x921   :  { %2217 = vsyncpa [#allocation16], 1 }
 0x922   :  { %2218 = vsyncpa [#allocation5], 1 }
 0x923   :  { %2219 = vsyncpa [#allocation19], 1 }
 0x924   :  { %2220 = vsyncpa [#allocation22], 1 }

</bundles_post_ra>
